<compile_context>
chip_gen: v7x
topology: tpu7x:2x2x1
jax: 0.10.0
libtpu: 0.0.40
codegen_flags: <defaults>
</compile_context>

<pallas_src>
import functools
import math

import numpy as np
import jax
import jax.numpy as jnp
from jax.experimental import pallas as pl
from jax.experimental.pallas import tpu as pltpu


# ----------------------------------------------------------------------------
# Pallas kernel: M/N/K-tiled matmul + bias + optional ReLU
# ----------------------------------------------------------------------------
def _mm_bias_act_kernel(a_ref, b_ref, bias_ref, o_ref, *, relu):
    k = pl.program_id(2)

    @pl.when(k == 0)
    def _():
        o_ref[...] = jnp.zeros_like(o_ref)

    # bf16 x bf16 -> f32 accumulate directly into the resident output tile.
    o_ref[...] += jnp.dot(a_ref[...], b_ref[...],
                          preferred_element_type=jnp.float32)

    @pl.when(k == pl.num_programs(2) - 1)
    def _():
        out = o_ref[...] + bias_ref[...]
        if relu:
            out = jnp.maximum(out, 0.0)
        o_ref[...] = out.astype(o_ref.dtype)


def _round_up(x, m):
    return ((x + m - 1) // m) * m


def _plan_m(m):
    p = _round_up(m, 8)
    if p <= 512:
        return p, p
    for t in (512, 384, 256, 128):
        if p % t == 0:
            return t, p
    p = _round_up(p, 256)
    return 256, p


def _plan_n(n):
    p = _round_up(n, 128)
    return (256 if p % 256 == 0 else 128), p


def _plan_k(k):
    p = _round_up(k, 128)
    for t in (512, 384, 256, 128):
        if p % t == 0:
            return t, p
    return 128, p


def matmul_bias_act(a, b, bias, relu=False):
    """out = act(a @ b + bias);  a:(M,K)  b:(K,N)  bias:(N,).  f32 result."""
    M, K = a.shape
    K2, N = b.shape
    assert K == K2
    tm, Mp = _plan_m(M)
    tn, Np = _plan_n(N)
    tk, Kp = _plan_k(K)

    a_p = jnp.pad(a.astype(jnp.bfloat16), ((0, Mp - M), (0, Kp - K)))
    b_p = jnp.pad(b.astype(jnp.bfloat16), ((0, Kp - K), (0, Np - N)))
    bias_p = jnp.pad(bias.astype(jnp.float32), ((0, Np - N),)).reshape(1, Np)

    grid = (Mp // tm, Np // tn, Kp // tk)

    out = pl.pallas_call(
        functools.partial(_mm_bias_act_kernel, relu=relu),
        out_shape=jax.ShapeDtypeStruct((Mp, Np), jnp.float32),
        grid_spec=pltpu.PrefetchScalarGridSpec(
            num_scalar_prefetch=0,
            grid=grid,
            in_specs=[
                pl.BlockSpec((tm, tk), lambda i, j, k: (i, k)),
                pl.BlockSpec((tk, tn), lambda i, j, k: (k, j)),
                pl.BlockSpec((1, tn), lambda i, j, k: (0, j)),
            ],
            out_specs=pl.BlockSpec((tm, tn), lambda i, j, k: (i, j)),
        ),
        compiler_params=pltpu.CompilerParams(
            dimension_semantics=("parallel", "parallel", "arbitrary")),
    )(a_p, b_p, bias_p)
    return out[:M, :N]


# ----------------------------------------------------------------------------
# Glue: im2col conv, BN folding, pooling / bilinear matrices
# ----------------------------------------------------------------------------
def im2col(x, ksize, stride, padding):
    """x: (B,H,W,C) -> (B*OH*OW, k*k*C), patch order (kh, kw, C)."""
    B, H, W, C = x.shape
    xp = jnp.pad(x, ((0, 0), (padding, padding), (padding, padding), (0, 0)))
    OH = (H + 2 * padding - ksize) // stride + 1
    OW = (W + 2 * padding - ksize) // stride + 1
    cols = []
    for kh in range(ksize):
        for kw in range(ksize):
            cols.append(xp[:, kh:kh + stride * OH:stride,
                           kw:kw + stride * OW:stride, :])
    patches = jnp.stack(cols, axis=3)            # (B,OH,OW,k*k,C)
    return patches.reshape(B * OH * OW, ksize * ksize * C), (B, OH, OW)


def conv2d(x, w, bias, stride=1, padding=0, relu=False):
    """x: (B,H,W,Cin), w: (kh,kw,Cin,Cout), bias: (Cout,)."""
    kh, kw, cin, cout = w.shape
    cols, (B, OH, OW) = im2col(x, kh, stride, padding)
    out = matmul_bias_act(cols, w.reshape(kh * kw * cin, cout), bias, relu=relu)
    return out.reshape(B, OH, OW, cout)


def fold_bn(w, bn_params, eps=1e-5):
    """Fold inference BatchNorm into conv weight (kh,kw,Cin,Cout) + bias."""
    gamma, beta, mean, var = bn_params
    scale = gamma / jnp.sqrt(var + eps)
    return w * scale, beta - mean * scale


def cbr(x, w, bn_params, stride=1, padding=0):
    wf, bf = fold_bn(w, bn_params)
    return conv2d(x, wf, bf, stride=stride, padding=padding, relu=True)


@functools.lru_cache(maxsize=None)
def adaptive_pool_matrix(ih, iw, s):
    """AdaptiveAvgPool2d(output=s) as a (s*s, ih*iw) averaging matrix (numpy)."""
    P = np.zeros((s * s, ih * iw), dtype=np.float32)
    for oy in range(s):
        y0 = (oy * ih) // s
        y1 = -(-((oy + 1) * ih) // s)
        for ox in range(s):
            x0 = (ox * iw) // s
            x1 = -(-((ox + 1) * iw) // s)
            n = (y1 - y0) * (x1 - x0)
            for y in range(y0, y1):
                for x in range(x0, x1):
                    P[oy * s + ox, y * iw + x] = 1.0 / n
    return P


@functools.lru_cache(maxsize=None)
def bilinear_matrix(ih, iw, oh, ow):
    """F.interpolate(mode='bilinear', align_corners=True) as (oh*ow, ih*iw) (numpy)."""
    P = np.zeros((oh * ow, ih * iw), dtype=np.float32)
    for oy in range(oh):
        sy = oy * (ih - 1) / (oh - 1) if oh > 1 else 0.0
        y0 = int(math.floor(sy))
        y1 = min(y0 + 1, ih - 1)
        wy = sy - y0
        for ox in range(ow):
            sx = ox * (iw - 1) / (ow - 1) if ow > 1 else 0.0
            x0 = int(math.floor(sx))
            x1 = min(x0 + 1, iw - 1)
            wx = sx - x0
            o = oy * ow + ox
            P[o, y0 * iw + x0] += (1 - wy) * (1 - wx)
            P[o, y0 * iw + x1] += (1 - wy) * wx
            P[o, y1 * iw + x0] += wy * (1 - wx)
            P[o, y1 * iw + x1] += wy * wx
    return P


# --- tiny pyramid-branch ops: plain XLA (Pallas launch overhead not worth it) ---
def adaptive_avg_pool_xla(x, s):
    B, H, W, C = x.shape
    P = jnp.asarray(adaptive_pool_matrix(H, W, s))
    y = jnp.einsum('oi,bic->boc', P, x.reshape(B, H * W, C))
    return y.reshape(B, s, s, C)


def bilinear_upsample_xla(x, oh, ow):
    B, H, W, C = x.shape
    U = jnp.asarray(bilinear_matrix(H, W, oh, ow))
    y = jnp.einsum('oi,bic->boc', U, x.reshape(B, H * W, C))
    return y.reshape(B, oh, ow, C)


# --- head: 1x1 classification conv + align_corners bilinear upsample, lane-dense ---
def head_cls_upsample(feat, w1x1, bias, oh, ow):
    """feat: (B,fh,fw,C), w1x1: (1,1,C,ncls), bias: (ncls,) -> NCHW (B,ncls,oh,ow)."""
    B, fh, fw, C = feat.shape
    ncls = w1x1.shape[-1]
    # Step 1: channel reduce in transposed form -> (ncls, B*fh*fw); N = pixels (lane-dense).
    d_t = feat.reshape(B * fh * fw, C).T                              # (C, B*fh*fw)
    w_t = w1x1.reshape(C, ncls).T                                     # (ncls, C)
    z = matmul_bias_act(w_t, d_t, jnp.zeros((B * fh * fw,), jnp.float32))
    # Step 2: spatial upsample; N = oh*ow (lane-dense).  Bilinear rows sum to 1, so the
    # classification bias commutes through the upsample and is added afterwards.
    z = z.reshape(ncls * B, fh * fw)
    U_t = jnp.asarray(bilinear_matrix(fh, fw, oh, ow)).T              # (fh*fw, oh*ow)
    out = matmul_bias_act(z, U_t, jnp.zeros((oh * ow,), jnp.float32))
    out = out.reshape(ncls, B, oh, ow) + bias.reshape(ncls, 1, 1, 1)
    return jnp.transpose(out, (1, 0, 2, 3))                           # NCHW


# ----------------------------------------------------------------------------
# Parameter init (deterministic, synthetic)
# ----------------------------------------------------------------------------
def init_params(key, n_classes, c3_ch, c4_ch, psp_mid, dec_mid, aux_mid):
    keys = iter(jax.random.split(key, 64))

    def conv_w(kh, kw, cin, cout):
        return 0.05 * jax.random.normal(next(keys), (kh, kw, cin, cout), jnp.float32)

    def bn(c):
        gamma = 1.0 + 0.1 * jax.random.normal(next(keys), (c,), jnp.float32)
        beta = 0.1 * jax.random.normal(next(keys), (c,), jnp.float32)
        mean = 0.1 * jax.random.normal(next(keys), (c,), jnp.float32)
        var = 1.0 + 0.1 * jnp.abs(jax.random.normal(next(keys), (c,), jnp.float32))
        return (gamma, beta, mean, var)

    p = {}
    # stand-in backbone (real ResNet50 backbone not provided in the module source)
    p["bb1_w"], p["bb1_bn"] = conv_w(3, 3, 3, 16), bn(16)
    p["bb2_w"], p["bb2_bn"] = conv_w(3, 3, 16, c3_ch), bn(c3_ch)
    p["bb3_w"], p["bb3_bn"] = conv_w(3, 3, c3_ch, c4_ch), bn(c4_ch)
    # pyramid pooling: 4 x (1x1 conv + BN + ReLU)
    for i in range(1, 5):
        p[f"psp{i}_w"], p[f"psp{i}_bn"] = conv_w(1, 1, c4_ch, psp_mid), bn(psp_mid)
    # decode feature: 3x3 conv+BN+ReLU, then 1x1 classification conv (with bias)
    p["dec_w"], p["dec_bn"] = conv_w(3, 3, c4_ch + 4 * psp_mid, dec_mid), bn(dec_mid)
    p["cls_w"] = conv_w(1, 1, dec_mid, n_classes)
    p["cls_b"] = 0.05 * jax.random.normal(next(keys), (n_classes,), jnp.float32)
    # auxiliary head
    p["aux_w"], p["aux_bn"] = conv_w(3, 3, c3_ch, aux_mid), bn(aux_mid)
    p["auxc_w"] = conv_w(1, 1, aux_mid, n_classes)
    p["auxc_b"] = 0.05 * jax.random.normal(next(keys), (n_classes,), jnp.float32)
    return p


# ----------------------------------------------------------------------------
# PSPNet forward
# ----------------------------------------------------------------------------
def pspnet_forward(params, x_nchw):
    B, _, H, W = x_nchw.shape
    x = jnp.transpose(x_nchw, (0, 2, 3, 1))            # NHWC

    # --- stand-in backbone: c3 and c4 at 1/4 resolution ---
    h = cbr(x, params["bb1_w"], params["bb1_bn"], stride=2, padding=1)
    c3 = cbr(h, params["bb2_w"], params["bb2_bn"], stride=2, padding=1)
    c4 = cbr(c3, params["bb3_w"], params["bb3_bn"], stride=1, padding=1)

    _, fh, fw, _ = c4.shape

    # --- PyramidPooling(in_channels=c4, pool_sizes=[6,3,2,1]) ---
    feats = [c4]
    for i, s in enumerate([6, 3, 2, 1], start=1):
        pooled = adaptive_avg_pool_xla(c4, s)
        wf, bf = fold_bn(params[f"psp{i}_w"], params[f"psp{i}_bn"])
        o = jnp.maximum(jnp.einsum('bhwc,co->bhwo', pooled, wf[0, 0]) + bf, 0.0)
        feats.append(bilinear_upsample_xla(o, fh, fw))
    psp = jnp.concatenate(feats, axis=-1)              # (B, fh, fw, 2*c4_ch)

    # --- DecodePSPFeature (Dropout2d is identity in eval mode) ---
    d = cbr(psp, params["dec_w"], params["dec_bn"], stride=1, padding=1)
    output = head_cls_upsample(d, params["cls_w"], params["cls_b"], H, W)

    # --- Auxiliary head on c3 (Dropout2d identity in eval mode) ---
    a = cbr(c3, params["aux_w"], params["aux_bn"], stride=1, padding=1)
    auxout = head_cls_upsample(a, params["auxc_w"], params["auxc_b"], H, W)

    return output, auxout                              # both NCHW


# ----------------------------------------------------------------------------
if __name__ == "__main__":
    n_classes = 8
    B, H, W = 2, 32, 32
    c3_ch, c4_ch = 64, 128          # scaled-down stand-ins for 1024 / 2048
    psp_mid = c4_ch // 4            # 2048/4 -> 128/4
    dec_mid = 32                    # scaled-down stand-in for 512
    aux_mid = 16                    # scaled-down stand-in for 256

    key = jax.random.PRNGKey(0)
    k_param, k_x = jax.random.split(key)
    params = init_params(k_param, n_classes, c3_ch, c4_ch, psp_mid, dec_mid, aux_mid)
    x = jax.random.normal(k_x, (B, 3, H, W), jnp.float32)

    fwd = jax.jit(pspnet_forward)
    output, auxout = fwd(params, x)
    output = jax.block_until_ready(output)
    auxout = jax.block_until_ready(auxout)

    assert output.shape == (B, n_classes, H, W), output.shape
    assert auxout.shape == (B, n_classes, H, W), auxout.shape
    assert bool(jnp.all(jnp.isfinite(output))) and bool(jnp.all(jnp.isfinite(auxout)))
    print("KERNEL_OK")
</pallas_src>

<mosaic_0001>
module attributes {stable_mosaic.version = 11 : i64} {
  func.func @_mm_bias_act_kernel(%arg0: i32, %arg1: i32, %arg2: i32, %arg3: memref<512x128xbf16, #tpu.memory_space<vmem>>, %arg4: memref<128x128xbf16, #tpu.memory_space<vmem>>, %arg5: memref<1x128xf32, #tpu.memory_space<vmem>>, %arg6: memref<512x128xf32, #tpu.memory_space<vmem>>) attributes {dimension_semantics = [#tpu.dimension_semantics<parallel>, #tpu.dimension_semantics<parallel>, #tpu.dimension_semantics<arbitrary>], iteration_bounds = array<i64: 1, 1, 1>, scalar_prefetch = 0 : i64, scratch_operands = 0 : i64, tpu.core_type = #tpu.core_type<tc>, window_params = [{transform_indices = @transform_0, window_bounds = array<i64: 512, 128>}, {transform_indices = @transform_1, window_bounds = array<i64: 128, 128>}, {transform_indices = @transform_2, window_bounds = array<i64: 1, 128>}, {transform_indices = @transform_3, window_bounds = array<i64: 512, 128>}]} {
    %c0_i32 = arith.constant 0 : i32
    %0 = arith.cmpi eq, %arg2, %c0_i32 : i32
    %1 = arith.extui %0 : i1 to i32
    %c0_i32_0 = arith.constant 0 : i32
    %2 = arith.cmpi ne, %1, %c0_i32_0 : i32
    scf.if %2 {
      %cst_10 = arith.constant 0.000000e+00 : f32
      %12 = vector.broadcast %cst_10 : f32 to vector<512x128xf32>
      %c0_11 = arith.constant 0 : index
      %c0_12 = arith.constant 0 : index
      %13 = vector.load %arg6[%c0_11, %c0_12] : memref<512x128xf32, #tpu.memory_space<vmem>>, vector<512x128xf32>
      tpu.vector_store %arg6[%c0_11, %c0_12], %12 {strides = array<i32>} : memref<512x128xf32, #tpu.memory_space<vmem>>, vector<512x128xf32>,
    } else {
    }
    %c0 = arith.constant 0 : index
    %c0_1 = arith.constant 0 : index
    %3 = vector.load %arg6[%c0, %c0_1] : memref<512x128xf32, #tpu.memory_space<vmem>>, vector<512x128xf32>
    %c0_2 = arith.constant 0 : index
    %c0_3 = arith.constant 0 : index
    %4 = vector.load %arg3[%c0_2, %c0_3] : memref<512x128xbf16, #tpu.memory_space<vmem>>, vector<512x128xbf16>
    %c0_4 = arith.constant 0 : index
    %c0_5 = arith.constant 0 : index
    %5 = vector.load %arg4[%c0_4, %c0_5] : memref<128x128xbf16, #tpu.memory_space<vmem>>, vector<128x128xbf16>
    %cst = arith.constant dense<0.000000e+00> : vector<512x128xf32>
    %6 = tpu.matmul %4, %5, %cst {dimension_numbers = #tpu.dot_dimension_numbers<[1], [0], [0], [1], [0, 0, 1, 1], [], []>} : vector<512x128xbf16>, vector<128x128xbf16>, vector<512x128xf32> -> vector<512x128xf32>
    %7 = arith.addf %3, %6 : vector<512x128xf32>
    %c0_6 = arith.constant 0 : index
    %c0_7 = arith.constant 0 : index
    %8 = vector.load %arg6[%c0_6, %c0_7] : memref<512x128xf32, #tpu.memory_space<vmem>>, vector<512x128xf32>
    tpu.vector_store %arg6[%c0_6, %c0_7], %7 {strides = array<i32>} : memref<512x128xf32, #tpu.memory_space<vmem>>, vector<512x128xf32>,
    %c0_i32_8 = arith.constant 0 : i32
    %9 = arith.cmpi eq, %arg2, %c0_i32_8 : i32
    %10 = arith.extui %9 : i1 to i32
    %c0_i32_9 = arith.constant 0 : i32
    %11 = arith.cmpi ne, %10, %c0_i32_9 : i32
    scf.if %11 {
      %c0_10 = arith.constant 0 : index
      %c0_11 = arith.constant 0 : index
      %12 = vector.load %arg6[%c0_10, %c0_11] : memref<512x128xf32, #tpu.memory_space<vmem>>, vector<512x128xf32>
      %c0_12 = arith.constant 0 : index
      %c0_13 = arith.constant 0 : index
      %13 = vector.load %arg5[%c0_12, %c0_13] : memref<1x128xf32, #tpu.memory_space<vmem>>, vector<1x128xf32>
      %14 = vector.broadcast %13 : vector<1x128xf32> to vector<512x128xf32>
      %15 = arith.addf %12, %14 : vector<512x128xf32>
      %cst_14 = arith.constant 0.000000e+00 : f32
      %16 = vector.broadcast %cst_14 : f32 to vector<512x128xf32>
      %17 = arith.maximumf %15, %16 : vector<512x128xf32>
      %c0_15 = arith.constant 0 : index
      %c0_16 = arith.constant 0 : index
      %18 = vector.load %arg6[%c0_15, %c0_16] : memref<512x128xf32, #tpu.memory_space<vmem>>, vector<512x128xf32>
      tpu.vector_store %arg6[%c0_15, %c0_16], %17 {strides = array<i32>} : memref<512x128xf32, #tpu.memory_space<vmem>>, vector<512x128xf32>,
    } else {
    }
    return
  }
  func.func @transform_0(%arg0: i32, %arg1: i32, %arg2: i32) -> (i32, i32) {
    %c0_i32 = arith.constant 0 : i32
    return %arg0, %arg2 : i32, i32
  }
  func.func @transform_1(%arg0: i32, %arg1: i32, %arg2: i32) -> (i32, i32) {
    %c0_i32 = arith.constant 0 : i32
    return %arg2, %arg1 : i32, i32
  }
  func.func @transform_2(%arg0: i32, %arg1: i32, %arg2: i32) -> (i32, i32) {
    %c0_i32 = arith.constant 0 : i32
    %c0_i32_0 = arith.constant 0 : i32
    return %c0_i32, %arg1 : i32, i32
  }
  func.func @transform_3(%arg0: i32, %arg1: i32, %arg2: i32) -> (i32, i32) {
    %c0_i32 = arith.constant 0 : i32
    return %arg0, %arg1 : i32, i32
  }
}

module attributes {stable_mosaic.version = 11 : i64} {
  func.func @_mm_bias_act_kernel(%arg0: i32, %arg1: i32, %arg2: i32, %arg3: memref<128x256xbf16, #tpu.memory_space<vmem>>, %arg4: memref<256x128xbf16, #tpu.memory_space<vmem>>, %arg5: memref<1x128xf32, #tpu.memory_space<vmem>>, %arg6: memref<128x128xf32, #tpu.memory_space<vmem>>) attributes {dimension_semantics = [#tpu.dimension_semantics<parallel>, #tpu.dimension_semantics<parallel>, #tpu.dimension_semantics<arbitrary>], iteration_bounds = array<i64: 1, 1, 1>, scalar_prefetch = 0 : i64, scratch_operands = 0 : i64, tpu.core_type = #tpu.core_type<tc>, window_params = [{transform_indices = @transform_0, window_bounds = array<i64: 128, 256>}, {transform_indices = @transform_1, window_bounds = array<i64: 256, 128>}, {transform_indices = @transform_2, window_bounds = array<i64: 1, 128>}, {transform_indices = @transform_3, window_bounds = array<i64: 128, 128>}]} {
    %c0_i32 = arith.constant 0 : i32
    %0 = arith.cmpi eq, %arg2, %c0_i32 : i32
    %1 = arith.extui %0 : i1 to i32
    %c0_i32_0 = arith.constant 0 : i32
    %2 = arith.cmpi ne, %1, %c0_i32_0 : i32
    scf.if %2 {
      %cst_10 = arith.constant 0.000000e+00 : f32
      %12 = vector.broadcast %cst_10 : f32 to vector<128x128xf32>
      %c0_11 = arith.constant 0 : index
      %c0_12 = arith.constant 0 : index
      %13 = vector.load %arg6[%c0_11, %c0_12] : memref<128x128xf32, #tpu.memory_space<vmem>>, vector<128x128xf32>
      tpu.vector_store %arg6[%c0_11, %c0_12], %12 {strides = array<i32>} : memref<128x128xf32, #tpu.memory_space<vmem>>, vector<128x128xf32>,
    } else {
    }
    %c0 = arith.constant 0 : index
    %c0_1 = arith.constant 0 : index
    %3 = vector.load %arg6[%c0, %c0_1] : memref<128x128xf32, #tpu.memory_space<vmem>>, vector<128x128xf32>
    %c0_2 = arith.constant 0 : index
    %c0_3 = arith.constant 0 : index
    %4 = vector.load %arg3[%c0_2, %c0_3] : memref<128x256xbf16, #tpu.memory_space<vmem>>, vector<128x256xbf16>
    %c0_4 = arith.constant 0 : index
    %c0_5 = arith.constant 0 : index
    %5 = vector.load %arg4[%c0_4, %c0_5] : memref<256x128xbf16, #tpu.memory_space<vmem>>, vector<256x128xbf16>
    %cst = arith.constant dense<0.000000e+00> : vector<128x128xf32>
    %6 = tpu.matmul %4, %5, %cst {dimension_numbers = #tpu.dot_dimension_numbers<[1], [0], [0], [1], [0, 0, 1, 1], [], []>} : vector<128x256xbf16>, vector<256x128xbf16>, vector<128x128xf32> -> vector<128x128xf32>
    %7 = arith.addf %3, %6 : vector<128x128xf32>
    %c0_6 = arith.constant 0 : index
    %c0_7 = arith.constant 0 : index
    %8 = vector.load %arg6[%c0_6, %c0_7] : memref<128x128xf32, #tpu.memory_space<vmem>>, vector<128x128xf32>
    tpu.vector_store %arg6[%c0_6, %c0_7], %7 {strides = array<i32>} : memref<128x128xf32, #tpu.memory_space<vmem>>, vector<128x128xf32>,
    %c0_i32_8 = arith.constant 0 : i32
    %9 = arith.cmpi eq, %arg2, %c0_i32_8 : i32
    %10 = arith.extui %9 : i1 to i32
    %c0_i32_9 = arith.constant 0 : i32
    %11 = arith.cmpi ne, %10, %c0_i32_9 : i32
    scf.if %11 {
      %c0_10 = arith.constant 0 : index
      %c0_11 = arith.constant 0 : index
      %12 = vector.load %arg6[%c0_10, %c0_11] : memref<128x128xf32, #tpu.memory_space<vmem>>, vector<128x128xf32>
      %c0_12 = arith.constant 0 : index
      %c0_13 = arith.constant 0 : index
      %13 = vector.load %arg5[%c0_12, %c0_13] : memref<1x128xf32, #tpu.memory_space<vmem>>, vector<1x128xf32>
      %14 = vector.broadcast %13 : vector<1x128xf32> to vector<128x128xf32>
      %15 = arith.addf %12, %14 : vector<128x128xf32>
      %cst_14 = arith.constant 0.000000e+00 : f32
      %16 = vector.broadcast %cst_14 : f32 to vector<128x128xf32>
      %17 = arith.maximumf %15, %16 : vector<128x128xf32>
      %c0_15 = arith.constant 0 : index
      %c0_16 = arith.constant 0 : index
      %18 = vector.load %arg6[%c0_15, %c0_16] : memref<128x128xf32, #tpu.memory_space<vmem>>, vector<128x128xf32>
      tpu.vector_store %arg6[%c0_15, %c0_16], %17 {strides = array<i32>} : memref<128x128xf32, #tpu.memory_space<vmem>>, vector<128x128xf32>,
    } else {
    }
    return
  }
  func.func @transform_0(%arg0: i32, %arg1: i32, %arg2: i32) -> (i32, i32) {
    %c0_i32 = arith.constant 0 : i32
    return %arg0, %arg2 : i32, i32
  }
  func.func @transform_1(%arg0: i32, %arg1: i32, %arg2: i32) -> (i32, i32) {
    %c0_i32 = arith.constant 0 : i32
    return %arg2, %arg1 : i32, i32
  }
  func.func @transform_2(%arg0: i32, %arg1: i32, %arg2: i32) -> (i32, i32) {
    %c0_i32 = arith.constant 0 : i32
    %c0_i32_0 = arith.constant 0 : i32
    return %c0_i32, %arg1 : i32, i32
  }
  func.func @transform_3(%arg0: i32, %arg1: i32, %arg2: i32) -> (i32, i32) {
    %c0_i32 = arith.constant 0 : i32
    return %arg0, %arg1 : i32, i32
  }
}

module attributes {stable_mosaic.version = 11 : i64} {
  func.func @_mm_bias_act_kernel(%arg0: i32, %arg1: i32, %arg2: i32, %arg3: memref<128x128xbf16, #tpu.memory_space<vmem>>, %arg4: memref<128x128xbf16, #tpu.memory_space<vmem>>, %arg5: memref<1x128xf32, #tpu.memory_space<vmem>>, %arg6: memref<128x128xf32, #tpu.memory_space<vmem>>) attributes {dimension_semantics = [#tpu.dimension_semantics<parallel>, #tpu.dimension_semantics<parallel>, #tpu.dimension_semantics<arbitrary>], iteration_bounds = array<i64: 1, 1, 5>, scalar_prefetch = 0 : i64, scratch_operands = 0 : i64, tpu.core_type = #tpu.core_type<tc>, window_params = [{transform_indices = @transform_0, window_bounds = array<i64: 128, 128>}, {transform_indices = @transform_1, window_bounds = array<i64: 128, 128>}, {transform_indices = @transform_2, window_bounds = array<i64: 1, 128>}, {transform_indices = @transform_3, window_bounds = array<i64: 128, 128>}]} {
    %c0_i32 = arith.constant 0 : i32
    %0 = arith.cmpi eq, %arg2, %c0_i32 : i32
    %1 = arith.extui %0 : i1 to i32
    %c0_i32_0 = arith.constant 0 : i32
    %2 = arith.cmpi ne, %1, %c0_i32_0 : i32
    scf.if %2 {
      %cst_9 = arith.constant 0.000000e+00 : f32
      %12 = vector.broadcast %cst_9 : f32 to vector<128x128xf32>
      %c0_10 = arith.constant 0 : index
      %c0_11 = arith.constant 0 : index
      %13 = vector.load %arg6[%c0_10, %c0_11] : memref<128x128xf32, #tpu.memory_space<vmem>>, vector<128x128xf32>
      tpu.vector_store %arg6[%c0_10, %c0_11], %12 {strides = array<i32>} : memref<128x128xf32, #tpu.memory_space<vmem>>, vector<128x128xf32>,
    } else {
    }
    %c0 = arith.constant 0 : index
    %c0_1 = arith.constant 0 : index
    %3 = vector.load %arg6[%c0, %c0_1] : memref<128x128xf32, #tpu.memory_space<vmem>>, vector<128x128xf32>
    %c0_2 = arith.constant 0 : index
    %c0_3 = arith.constant 0 : index
    %4 = vector.load %arg3[%c0_2, %c0_3] : memref<128x128xbf16, #tpu.memory_space<vmem>>, vector<128x128xbf16>
    %c0_4 = arith.constant 0 : index
    %c0_5 = arith.constant 0 : index
    %5 = vector.load %arg4[%c0_4, %c0_5] : memref<128x128xbf16, #tpu.memory_space<vmem>>, vector<128x128xbf16>
    %cst = arith.constant dense<0.000000e+00> : vector<128x128xf32>
    %6 = tpu.matmul %4, %5, %cst {dimension_numbers = #tpu.dot_dimension_numbers<[1], [0], [0], [1], [0, 0, 1, 1], [], []>} : vector<128x128xbf16>, vector<128x128xbf16>, vector<128x128xf32> -> vector<128x128xf32>
    %7 = arith.addf %3, %6 : vector<128x128xf32>
    %c0_6 = arith.constant 0 : index
    %c0_7 = arith.constant 0 : index
    %8 = vector.load %arg6[%c0_6, %c0_7] : memref<128x128xf32, #tpu.memory_space<vmem>>, vector<128x128xf32>
    tpu.vector_store %arg6[%c0_6, %c0_7], %7 {strides = array<i32>} : memref<128x128xf32, #tpu.memory_space<vmem>>, vector<128x128xf32>,
    %c4_i32 = arith.constant 4 : i32
    %9 = arith.cmpi eq, %arg2, %c4_i32 : i32
    %10 = arith.extui %9 : i1 to i32
    %c0_i32_8 = arith.constant 0 : i32
    %11 = arith.cmpi ne, %10, %c0_i32_8 : i32
    scf.if %11 {
      %c0_9 = arith.constant 0 : index
      %c0_10 = arith.constant 0 : index
      %12 = vector.load %arg6[%c0_9, %c0_10] : memref<128x128xf32, #tpu.memory_space<vmem>>, vector<128x128xf32>
      %c0_11 = arith.constant 0 : index
      %c0_12 = arith.constant 0 : index
      %13 = vector.load %arg5[%c0_11, %c0_12] : memref<1x128xf32, #tpu.memory_space<vmem>>, vector<1x128xf32>
      %14 = vector.broadcast %13 : vector<1x128xf32> to vector<128x128xf32>
      %15 = arith.addf %12, %14 : vector<128x128xf32>
      %cst_13 = arith.constant 0.000000e+00 : f32
      %16 = vector.broadcast %cst_13 : f32 to vector<128x128xf32>
      %17 = arith.maximumf %15, %16 : vector<128x128xf32>
      %c0_14 = arith.constant 0 : index
      %c0_15 = arith.constant 0 : index
      %18 = vector.load %arg6[%c0_14, %c0_15] : memref<128x128xf32, #tpu.memory_space<vmem>>, vector<128x128xf32>
      tpu.vector_store %arg6[%c0_14, %c0_15], %17 {strides = array<i32>} : memref<128x128xf32, #tpu.memory_space<vmem>>, vector<128x128xf32>,
    } else {
    }
    return
  }
  func.func @transform_0(%arg0: i32, %arg1: i32, %arg2: i32) -> (i32, i32) {
    %c0_i32 = arith.constant 0 : i32
    return %arg0, %arg2 : i32, i32
  }
  func.func @transform_1(%arg0: i32, %arg1: i32, %arg2: i32) -> (i32, i32) {
    %c0_i32 = arith.constant 0 : i32
    return %arg2, %arg1 : i32, i32
  }
  func.func @transform_2(%arg0: i32, %arg1: i32, %arg2: i32) -> (i32, i32) {
    %c0_i32 = arith.constant 0 : i32
    %c0_i32_0 = arith.constant 0 : i32
    return %c0_i32, %arg1 : i32, i32
  }
  func.func @transform_3(%arg0: i32, %arg1: i32, %arg2: i32) -> (i32, i32) {
    %c0_i32 = arith.constant 0 : i32
    return %arg0, %arg1 : i32, i32
  }
}

module attributes {stable_mosaic.version = 11 : i64} {
  func.func @_mm_bias_act_kernel(%arg0: i32, %arg1: i32, %arg2: i32, %arg3: memref<128x384xbf16, #tpu.memory_space<vmem>>, %arg4: memref<384x128xbf16, #tpu.memory_space<vmem>>, %arg5: memref<1x128xf32, #tpu.memory_space<vmem>>, %arg6: memref<128x128xf32, #tpu.memory_space<vmem>>) attributes {dimension_semantics = [#tpu.dimension_semantics<parallel>, #tpu.dimension_semantics<parallel>, #tpu.dimension_semantics<arbitrary>], iteration_bounds = array<i64: 1, 1, 6>, scalar_prefetch = 0 : i64, scratch_operands = 0 : i64, tpu.core_type = #tpu.core_type<tc>, window_params = [{transform_indices = @transform_0, window_bounds = array<i64: 128, 384>}, {transform_indices = @transform_1, window_bounds = array<i64: 384, 128>}, {transform_indices = @transform_2, window_bounds = array<i64: 1, 128>}, {transform_indices = @transform_3, window_bounds = array<i64: 128, 128>}]} {
    %c0_i32 = arith.constant 0 : i32
    %0 = arith.cmpi eq, %arg2, %c0_i32 : i32
    %1 = arith.extui %0 : i1 to i32
    %c0_i32_0 = arith.constant 0 : i32
    %2 = arith.cmpi ne, %1, %c0_i32_0 : i32
    scf.if %2 {
      %cst_9 = arith.constant 0.000000e+00 : f32
      %12 = vector.broadcast %cst_9 : f32 to vector<128x128xf32>
      %c0_10 = arith.constant 0 : index
      %c0_11 = arith.constant 0 : index
      %13 = vector.load %arg6[%c0_10, %c0_11] : memref<128x128xf32, #tpu.memory_space<vmem>>, vector<128x128xf32>
      tpu.vector_store %arg6[%c0_10, %c0_11], %12 {strides = array<i32>} : memref<128x128xf32, #tpu.memory_space<vmem>>, vector<128x128xf32>,
    } else {
    }
    %c0 = arith.constant 0 : index
    %c0_1 = arith.constant 0 : index
    %3 = vector.load %arg6[%c0, %c0_1] : memref<128x128xf32, #tpu.memory_space<vmem>>, vector<128x128xf32>
    %c0_2 = arith.constant 0 : index
    %c0_3 = arith.constant 0 : index
    %4 = vector.load %arg3[%c0_2, %c0_3] : memref<128x384xbf16, #tpu.memory_space<vmem>>, vector<128x384xbf16>
    %c0_4 = arith.constant 0 : index
    %c0_5 = arith.constant 0 : index
    %5 = vector.load %arg4[%c0_4, %c0_5] : memref<384x128xbf16, #tpu.memory_space<vmem>>, vector<384x128xbf16>
    %cst = arith.constant dense<0.000000e+00> : vector<128x128xf32>
    %6 = tpu.matmul %4, %5, %cst {dimension_numbers = #tpu.dot_dimension_numbers<[1], [0], [0], [1], [0, 0, 1, 1], [], []>} : vector<128x384xbf16>, vector<384x128xbf16>, vector<128x128xf32> -> vector<128x128xf32>
    %7 = arith.addf %3, %6 : vector<128x128xf32>
    %c0_6 = arith.constant 0 : index
    %c0_7 = arith.constant 0 : index
    %8 = vector.load %arg6[%c0_6, %c0_7] : memref<128x128xf32, #tpu.memory_space<vmem>>, vector<128x128xf32>
    tpu.vector_store %arg6[%c0_6, %c0_7], %7 {strides = array<i32>} : memref<128x128xf32, #tpu.memory_space<vmem>>, vector<128x128xf32>,
    %c5_i32 = arith.constant 5 : i32
    %9 = arith.cmpi eq, %arg2, %c5_i32 : i32
    %10 = arith.extui %9 : i1 to i32
    %c0_i32_8 = arith.constant 0 : i32
    %11 = arith.cmpi ne, %10, %c0_i32_8 : i32
    scf.if %11 {
      %c0_9 = arith.constant 0 : index
      %c0_10 = arith.constant 0 : index
      %12 = vector.load %arg6[%c0_9, %c0_10] : memref<128x128xf32, #tpu.memory_space<vmem>>, vector<128x128xf32>
      %c0_11 = arith.constant 0 : index
      %c0_12 = arith.constant 0 : index
      %13 = vector.load %arg5[%c0_11, %c0_12] : memref<1x128xf32, #tpu.memory_space<vmem>>, vector<1x128xf32>
      %14 = vector.broadcast %13 : vector<1x128xf32> to vector<128x128xf32>
      %15 = arith.addf %12, %14 : vector<128x128xf32>
      %cst_13 = arith.constant 0.000000e+00 : f32
      %16 = vector.broadcast %cst_13 : f32 to vector<128x128xf32>
      %17 = arith.maximumf %15, %16 : vector<128x128xf32>
      %c0_14 = arith.constant 0 : index
      %c0_15 = arith.constant 0 : index
      %18 = vector.load %arg6[%c0_14, %c0_15] : memref<128x128xf32, #tpu.memory_space<vmem>>, vector<128x128xf32>
      tpu.vector_store %arg6[%c0_14, %c0_15], %17 {strides = array<i32>} : memref<128x128xf32, #tpu.memory_space<vmem>>, vector<128x128xf32>,
    } else {
    }
    return
  }
  func.func @transform_0(%arg0: i32, %arg1: i32, %arg2: i32) -> (i32, i32) {
    %c0_i32 = arith.constant 0 : i32
    return %arg0, %arg2 : i32, i32
  }
  func.func @transform_1(%arg0: i32, %arg1: i32, %arg2: i32) -> (i32, i32) {
    %c0_i32 = arith.constant 0 : i32
    return %arg2, %arg1 : i32, i32
  }
  func.func @transform_2(%arg0: i32, %arg1: i32, %arg2: i32) -> (i32, i32) {
    %c0_i32 = arith.constant 0 : i32
    %c0_i32_0 = arith.constant 0 : i32
    return %c0_i32, %arg1 : i32, i32
  }
  func.func @transform_3(%arg0: i32, %arg1: i32, %arg2: i32) -> (i32, i32) {
    %c0_i32 = arith.constant 0 : i32
    return %arg0, %arg1 : i32, i32
  }
}

module attributes {stable_mosaic.version = 11 : i64} {
  func.func @_mm_bias_act_kernel(%arg0: i32, %arg1: i32, %arg2: i32, %arg3: memref<8x128xbf16, #tpu.memory_space<vmem>>, %arg4: memref<128x128xbf16, #tpu.memory_space<vmem>>, %arg5: memref<1x128xf32, #tpu.memory_space<vmem>>, %arg6: memref<8x128xf32, #tpu.memory_space<vmem>>) attributes {dimension_semantics = [#tpu.dimension_semantics<parallel>, #tpu.dimension_semantics<parallel>, #tpu.dimension_semantics<arbitrary>], iteration_bounds = array<i64: 1, 1, 1>, scalar_prefetch = 0 : i64, scratch_operands = 0 : i64, tpu.core_type = #tpu.core_type<tc>, window_params = [{transform_indices = @transform_0, window_bounds = array<i64: 8, 128>}, {transform_indices = @transform_1, window_bounds = array<i64: 128, 128>}, {transform_indices = @transform_2, window_bounds = array<i64: 1, 128>}, {transform_indices = @transform_3, window_bounds = array<i64: 8, 128>}]} {
    %c0_i32 = arith.constant 0 : i32
    %0 = arith.cmpi eq, %arg2, %c0_i32 : i32
    %1 = arith.extui %0 : i1 to i32
    %c0_i32_0 = arith.constant 0 : i32
    %2 = arith.cmpi ne, %1, %c0_i32_0 : i32
    scf.if %2 {
      %cst_10 = arith.constant 0.000000e+00 : f32
      %12 = vector.broadcast %cst_10 : f32 to vector<8x128xf32>
      %c0_11 = arith.constant 0 : index
      %c0_12 = arith.constant 0 : index
      %13 = vector.load %arg6[%c0_11, %c0_12] : memref<8x128xf32, #tpu.memory_space<vmem>>, vector<8x128xf32>
      tpu.vector_store %arg6[%c0_11, %c0_12], %12 {strides = array<i32>} : memref<8x128xf32, #tpu.memory_space<vmem>>, vector<8x128xf32>,
    } else {
    }
    %c0 = arith.constant 0 : index
    %c0_1 = arith.constant 0 : index
    %3 = vector.load %arg6[%c0, %c0_1] : memref<8x128xf32, #tpu.memory_space<vmem>>, vector<8x128xf32>
    %c0_2 = arith.constant 0 : index
    %c0_3 = arith.constant 0 : index
    %4 = vector.load %arg3[%c0_2, %c0_3] : memref<8x128xbf16, #tpu.memory_space<vmem>>, vector<8x128xbf16>
    %c0_4 = arith.constant 0 : index
    %c0_5 = arith.constant 0 : index
    %5 = vector.load %arg4[%c0_4, %c0_5] : memref<128x128xbf16, #tpu.memory_space<vmem>>, vector<128x128xbf16>
    %cst = arith.constant dense<0.000000e+00> : vector<8x128xf32>
    %6 = tpu.matmul %4, %5, %cst {dimension_numbers = #tpu.dot_dimension_numbers<[1], [0], [0], [1], [0, 0, 1, 1], [], []>} : vector<8x128xbf16>, vector<128x128xbf16>, vector<8x128xf32> -> vector<8x128xf32>
    %7 = arith.addf %3, %6 : vector<8x128xf32>
    %c0_6 = arith.constant 0 : index
    %c0_7 = arith.constant 0 : index
    %8 = vector.load %arg6[%c0_6, %c0_7] : memref<8x128xf32, #tpu.memory_space<vmem>>, vector<8x128xf32>
    tpu.vector_store %arg6[%c0_6, %c0_7], %7 {strides = array<i32>} : memref<8x128xf32, #tpu.memory_space<vmem>>, vector<8x128xf32>,
    %c0_i32_8 = arith.constant 0 : i32
    %9 = arith.cmpi eq, %arg2, %c0_i32_8 : i32
    %10 = arith.extui %9 : i1 to i32
    %c0_i32_9 = arith.constant 0 : i32
    %11 = arith.cmpi ne, %10, %c0_i32_9 : i32
    scf.if %11 {
      %c0_10 = arith.constant 0 : index
      %c0_11 = arith.constant 0 : index
      %12 = vector.load %arg6[%c0_10, %c0_11] : memref<8x128xf32, #tpu.memory_space<vmem>>, vector<8x128xf32>
      %c0_12 = arith.constant 0 : index
      %c0_13 = arith.constant 0 : index
      %13 = vector.load %arg5[%c0_12, %c0_13] : memref<1x128xf32, #tpu.memory_space<vmem>>, vector<1x128xf32>
      %14 = vector.broadcast %13 : vector<1x128xf32> to vector<8x128xf32>
      %15 = arith.addf %12, %14 : vector<8x128xf32>
      %c0_14 = arith.constant 0 : index
      %c0_15 = arith.constant 0 : index
      %16 = vector.load %arg6[%c0_14, %c0_15] : memref<8x128xf32, #tpu.memory_space<vmem>>, vector<8x128xf32>
      tpu.vector_store %arg6[%c0_14, %c0_15], %15 {strides = array<i32>} : memref<8x128xf32, #tpu.memory_space<vmem>>, vector<8x128xf32>,
    } else {
    }
    return
  }
  func.func @transform_0(%arg0: i32, %arg1: i32, %arg2: i32) -> (i32, i32) {
    %c0_i32 = arith.constant 0 : i32
    return %arg0, %arg2 : i32, i32
  }
  func.func @transform_1(%arg0: i32, %arg1: i32, %arg2: i32) -> (i32, i32) {
    %c0_i32 = arith.constant 0 : i32
    return %arg2, %arg1 : i32, i32
  }
  func.func @transform_2(%arg0: i32, %arg1: i32, %arg2: i32) -> (i32, i32) {
    %c0_i32 = arith.constant 0 : i32
    %c0_i32_0 = arith.constant 0 : i32
    return %c0_i32, %arg1 : i32, i32
  }
  func.func @transform_3(%arg0: i32, %arg1: i32, %arg2: i32) -> (i32, i32) {
    %c0_i32 = arith.constant 0 : i32
    return %arg0, %arg1 : i32, i32
  }
}

module attributes {stable_mosaic.version = 11 : i64} {
  func.func @_mm_bias_act_kernel(%arg0: i32, %arg1: i32, %arg2: i32, %arg3: memref<16x128xbf16, #tpu.memory_space<vmem>>, %arg4: memref<128x256xbf16, #tpu.memory_space<vmem>>, %arg5: memref<1x256xf32, #tpu.memory_space<vmem>>, %arg6: memref<16x256xf32, #tpu.memory_space<vmem>>) attributes {dimension_semantics = [#tpu.dimension_semantics<parallel>, #tpu.dimension_semantics<parallel>, #tpu.dimension_semantics<arbitrary>], iteration_bounds = array<i64: 1, 4, 1>, scalar_prefetch = 0 : i64, scratch_operands = 0 : i64, tpu.core_type = #tpu.core_type<tc>, window_params = [{transform_indices = @transform_0, window_bounds = array<i64: 16, 128>}, {transform_indices = @transform_1, window_bounds = array<i64: 128, 256>}, {transform_indices = @transform_2, window_bounds = array<i64: 1, 256>}, {transform_indices = @transform_3, window_bounds = array<i64: 16, 256>}]} {
    %c0_i32 = arith.constant 0 : i32
    %0 = arith.cmpi eq, %arg2, %c0_i32 : i32
    %1 = arith.extui %0 : i1 to i32
    %c0_i32_0 = arith.constant 0 : i32
    %2 = arith.cmpi ne, %1, %c0_i32_0 : i32
    scf.if %2 {
      %cst_10 = arith.constant 0.000000e+00 : f32
      %12 = vector.broadcast %cst_10 : f32 to vector<16x256xf32>
      %c0_11 = arith.constant 0 : index
      %c0_12 = arith.constant 0 : index
      %13 = vector.load %arg6[%c0_11, %c0_12] : memref<16x256xf32, #tpu.memory_space<vmem>>, vector<16x256xf32>
      tpu.vector_store %arg6[%c0_11, %c0_12], %12 {strides = array<i32>} : memref<16x256xf32, #tpu.memory_space<vmem>>, vector<16x256xf32>,
    } else {
    }
    %c0 = arith.constant 0 : index
    %c0_1 = arith.constant 0 : index
    %3 = vector.load %arg6[%c0, %c0_1] : memref<16x256xf32, #tpu.memory_space<vmem>>, vector<16x256xf32>
    %c0_2 = arith.constant 0 : index
    %c0_3 = arith.constant 0 : index
    %4 = vector.load %arg3[%c0_2, %c0_3] : memref<16x128xbf16, #tpu.memory_space<vmem>>, vector<16x128xbf16>
    %c0_4 = arith.constant 0 : index
    %c0_5 = arith.constant 0 : index
    %5 = vector.load %arg4[%c0_4, %c0_5] : memref<128x256xbf16, #tpu.memory_space<vmem>>, vector<128x256xbf16>
    %cst = arith.constant dense<0.000000e+00> : vector<16x256xf32>
    %6 = tpu.matmul %4, %5, %cst {dimension_numbers = #tpu.dot_dimension_numbers<[1], [0], [0], [1], [0, 0, 1, 1], [], []>} : vector<16x128xbf16>, vector<128x256xbf16>, vector<16x256xf32> -> vector<16x256xf32>
    %7 = arith.addf %3, %6 : vector<16x256xf32>
    %c0_6 = arith.constant 0 : index
    %c0_7 = arith.constant 0 : index
    %8 = vector.load %arg6[%c0_6, %c0_7] : memref<16x256xf32, #tpu.memory_space<vmem>>, vector<16x256xf32>
    tpu.vector_store %arg6[%c0_6, %c0_7], %7 {strides = array<i32>} : memref<16x256xf32, #tpu.memory_space<vmem>>, vector<16x256xf32>,
    %c0_i32_8 = arith.constant 0 : i32
    %9 = arith.cmpi eq, %arg2, %c0_i32_8 : i32
    %10 = arith.extui %9 : i1 to i32
    %c0_i32_9 = arith.constant 0 : i32
    %11 = arith.cmpi ne, %10, %c0_i32_9 : i32
    scf.if %11 {
      %c0_10 = arith.constant 0 : index
      %c0_11 = arith.constant 0 : index
      %12 = vector.load %arg6[%c0_10, %c0_11] : memref<16x256xf32, #tpu.memory_space<vmem>>, vector<16x256xf32>
      %c0_12 = arith.constant 0 : index
      %c0_13 = arith.constant 0 : index
      %13 = vector.load %arg5[%c0_12, %c0_13] : memref<1x256xf32, #tpu.memory_space<vmem>>, vector<1x256xf32>
      %14 = vector.broadcast %13 : vector<1x256xf32> to vector<16x256xf32>
      %15 = arith.addf %12, %14 : vector<16x256xf32>
      %c0_14 = arith.constant 0 : index
      %c0_15 = arith.constant 0 : index
      %16 = vector.load %arg6[%c0_14, %c0_15] : memref<16x256xf32, #tpu.memory_space<vmem>>, vector<16x256xf32>
      tpu.vector_store %arg6[%c0_14, %c0_15], %15 {strides = array<i32>} : memref<16x256xf32, #tpu.memory_space<vmem>>, vector<16x256xf32>,
    } else {
    }
    return
  }
  func.func @transform_0(%arg0: i32, %arg1: i32, %arg2: i32) -> (i32, i32) {
    %c0_i32 = arith.constant 0 : i32
    return %arg0, %arg2 : i32, i32
  }
  func.func @transform_1(%arg0: i32, %arg1: i32, %arg2: i32) -> (i32, i32) {
    %c0_i32 = arith.constant 0 : i32
    return %arg2, %arg1 : i32, i32
  }
  func.func @transform_2(%arg0: i32, %arg1: i32, %arg2: i32) -> (i32, i32) {
    %c0_i32 = arith.constant 0 : i32
    %c0_i32_0 = arith.constant 0 : i32
    return %c0_i32, %arg1 : i32, i32
  }
  func.func @transform_3(%arg0: i32, %arg1: i32, %arg2: i32) -> (i32, i32) {
    %c0_i32 = arith.constant 0 : i32
    return %arg0, %arg1 : i32, i32
  }
}

</mosaic_0001>

<bundles_post_ra>
// kernel: pspnet_forward.9
= control target key start
LH: loop header
LB: loop body
LE: loop exit
PB: predicated region body
PF: predicated region fallthrough
CT: control target
= control target key end

     0   :  { %s1773_s1 = inlined_call_operand.vmem [shape: bf16[128,128], index: 1, kind: input, shape index: {}]   ;;  %s1774_s0 = inlined_call_operand.vmem [shape: bf16[512,128], index: 0, kind: input, shape index: {}]   ;;  %s1775_s2 = inlined_call_operand.vmem [shape: f32[1,128], index: 2, kind: input, shape index: {}]   ;;  %s1776_s3 = inlined_call_operand.vmem [shape: f32[512,128], index: 3, kind: output, shape index: {}]  }
   0x1   :  { %v1332_v0 = vld [vmem:[%s1773_s1] sm:$0xff]   ;;  %v1333_v1 = vld [vmem:[%s1773_s1 + $0x8] sm:$0xff]   ;;  %v1334_v2 = vld [vmem:[%s1773_s1 + $0x10] sm:$0xff]  }
   0x2   :  { %1235 = vmatprep.subr.bf16.mxu0 %v1332_v0  ;;  %1315 = vmatprep.subr.bf16.mxu1 %v1332_v0  ;;  %v1335_v3 = vld [vmem:[%s1773_s1 + $0x18] sm:$0xff]   ;;  %v1340_v4 = vld [vmem:[%s1774_s0] sm:$0xff]   ;;  %v1337_v7 = vld [vmem:[%s1773_s1 + $0x28] sm:$0xff]  }
   0x3   :  { %1236 = vmatpush3.bf16.msra.mxu0 %v1332_v0  ;;  %1323 = vmatpush3.bf16.msra.mxu1 %v1332_v0  ;;  %v1341_v5 = vld [vmem:[%s1774_s0 + $0x80] sm:$0xff]   ;;  %v1338_v8 = vld [vmem:[%s1773_s1 + $0x30] sm:$0xff]   ;;  %v1339_v9 = vld [vmem:[%s1773_s1 + $0x38] sm:$0xff]  }
   0x4   :  { %1237 = vmatprep.subr.bf16.mxu0 %v1333_v1  ;;  %1316 = vmatprep.subr.bf16.mxu1 %v1333_v1  ;;  %v1336_v6 = vld [vmem:[%s1773_s1 + $0x20] sm:$0xff]   ;;  %v1342_v10 = vld [vmem:[%s1774_s0 + $0x8] sm:$0xff]   ;;  %v1344_v12 = vld [vmem:[%s1774_s0 + $0x10] sm:$0xff]  }
   0x5   :  { %1251 = vmatprep.mubr.bf16.mxu0 %v1340_v4  ;;  %1283 = vmatprep.mubr.bf16.mxu1 %v1341_v5  ;;  %v1343_v11 = vld [vmem:[%s1774_s0 + $0x88] sm:$0xff]   ;;  %v1345_v13 = vld [vmem:[%s1774_s0 + $0x90] sm:$0xff]   ;;  %v1346_v14 = vld [vmem:[%s1774_s0 + $0x18] sm:$0xff]  }
   0x6   :  { %v1347_v15 = vld [vmem:[%s1774_s0 + $0x98] sm:$0xff]   ;;  %v1348_v16 = vld [vmem:[%s1774_s0 + $0x20] sm:$0xff]   ;;  %v1350_v18 = vld [vmem:[%s1774_s0 + $0x28] sm:$0xff]  }
   0x7   :  { %1238 = vmatpush3.bf16.msra.mxu0 %v1333_v1  ;;  %1324 = vmatpush3.bf16.msra.mxu1 %v1333_v1  ;;  %v1349_v17 = vld [vmem:[%s1774_s0 + $0xa0] sm:$0xff]   ;;  %v1351_v19 = vld [vmem:[%s1774_s0 + $0xa8] sm:$0xff]   ;;  %v1352_v20 = vld [vmem:[%s1774_s0 + $0x30] sm:$0xff]  }
   0x8   :  { %1239 = vmatprep.subr.bf16.mxu0 %v1334_v2  ;;  %1317 = vmatprep.subr.bf16.mxu1 %v1334_v2  ;;  %v1353_v21 = vld [vmem:[%s1774_s0 + $0xb0] sm:$0xff]   ;;  %v1354_v22 = vld [vmem:[%s1774_s0 + $0x38] sm:$0xff]   ;;  %v1356_v24 = vld [vmem:[%s1774_s0 + $0x40] sm:$0xff]  }
   0x9   :  { %v1355_v23 = vld [vmem:[%s1774_s0 + $0xb8] sm:$0xff]   ;;  %v1357_v25 = vld [vmem:[%s1774_s0 + $0xc0] sm:$0xff]   ;;  %v1358_v26 = vld [vmem:[%s1774_s0 + $0x48] sm:$0xff]  }
   0xa   :  { %v1359_v27 = vld [vmem:[%s1774_s0 + $0xc8] sm:$0xff]   ;;  %v1360_v28 = vld [vmem:[%s1774_s0 + $0x50] sm:$0xff]   ;;  %v1362_v30 = vld [vmem:[%s1774_s0 + $0x58] sm:$0xff]  }
   0xb   :  { %1240 = vmatpush3.bf16.msra.mxu0 %v1334_v2  ;;  %1325 = vmatpush3.bf16.msra.mxu1 %v1334_v2  ;;  %v1361_v29 = vld [vmem:[%s1774_s0 + $0xd0] sm:$0xff]   ;;  %v1363_v31 = vld [vmem:[%s1774_s0 + $0xd8] sm:$0xff]   ;;  %v1364_v32 = vld [vmem:[%s1774_s0 + $0x60] sm:$0xff]  }
   0xc   :  { %1241 = vmatprep.subr.bf16.mxu0 %v1335_v3  ;;  %1318 = vmatprep.subr.bf16.mxu1 %v1335_v3  ;;  %v1365_v33 = vld [vmem:[%s1774_s0 + $0xe0] sm:$0xff]   ;;  %v1366_v34 = vld [vmem:[%s1774_s0 + $0x68] sm:$0xff]   ;;  %v1368_v36 = vld [vmem:[%s1774_s0 + $0x70] sm:$0xff]  }
   0xd   :  { %v1367_v35 = vld [vmem:[%s1774_s0 + $0xe8] sm:$0xff]   ;;  %v1369_v37 = vld [vmem:[%s1774_s0 + $0xf0] sm:$0xff]   ;;  %v1370_v38 = vld [vmem:[%s1774_s0 + $0x78] sm:$0xff]  }
   0xe   :  { %v1371_v39 = vld [vmem:[%s1774_s0 + $0xf8] sm:$0xff]   ;;  %v1515_v41 = vld [vmem:[%s1775_s2] ss:$0 sm:$0xff] }
   0xf   :  { %1242 = vmatpush3.bf16.msra.mxu0 %v1335_v3  ;;  %1326 = vmatpush3.bf16.msra.mxu1 %v1335_v3 }
  0x10   :  { %1243 = vmatprep.subr.bf16.mxu0 %v1336_v6  ;;  %1319 = vmatprep.subr.bf16.mxu1 %v1336_v6 }
  0x13   :  { %1244 = vmatpush3.bf16.msra.mxu0 %v1336_v6  ;;  %1327 = vmatpush3.bf16.msra.mxu1 %v1336_v6 }
  0x14   :  { %1245 = vmatprep.subr.bf16.mxu0 %v1337_v7  ;;  %1320 = vmatprep.subr.bf16.mxu1 %v1337_v7 }
  0x17   :  { %1246 = vmatpush3.bf16.msra.mxu0 %v1337_v7  ;;  %1328 = vmatpush3.bf16.msra.mxu1 %v1337_v7 }
  0x18   :  { %1247 = vmatprep.subr.bf16.mxu0 %v1338_v8  ;;  %1321 = vmatprep.subr.bf16.mxu1 %v1338_v8 }
  0x1b   :  { %1248 = vmatpush3.bf16.msra.mxu0 %v1338_v8  ;;  %1329 = vmatpush3.bf16.msra.mxu1 %v1338_v8 }
  0x1c   :  { %1249 = vmatprep.subr.bf16.mxu0 %v1339_v9  ;;  %1322 = vmatprep.subr.bf16.mxu1 %v1339_v9 }
  0x1f   :  { %1250 = vmatpush3.bf16.msra.mxu0 %v1339_v9  ;;  %1330 = vmatpush3.bf16.msra.mxu1 %v1339_v9 }
  0x22   :  { %1252 = vmatmul.mubr.bf16.vlgmr.msra.gmra.mrb[0].mxu0 %v1342_v10  ;;  %1284 = vmatmul.mubr.bf16.vlgmr.msra.gmra.mrb[0].mxu1 %v1343_v11 }
  0x23   :  { %1255 = vmatprep.mubr.bf16.mxu0 %v1344_v12  ;;  %1287 = vmatprep.mubr.bf16.mxu1 %v1345_v13 }
  0x2a   :  { %1256 = vmatmul.mubr.bf16.gmra.mrb[4].mxu0 %v1346_v14  ;;  %1288 = vmatmul.mubr.bf16.gmra.mrb[4].mxu1 %v1347_v15 }
  0x2b   :  { %1259 = vmatprep.mubr.bf16.mxu0 %v1348_v16  ;;  %1291 = vmatprep.mubr.bf16.mxu1 %v1349_v17 }
  0x32   :  { %1260 = vmatmul.mubr.bf16.gmra.mrb[8].mxu0 %v1350_v18  ;;  %1292 = vmatmul.mubr.bf16.gmra.mrb[8].mxu1 %v1351_v19 }
  0x33   :  { %1263 = vmatprep.mubr.bf16.mxu0 %v1352_v20  ;;  %1295 = vmatprep.mubr.bf16.mxu1 %v1353_v21 }
  0x3a   :  { %1264 = vmatmul.mubr.bf16.gmra.mrb[12].mxu0 %v1354_v22  ;;  %1296 = vmatmul.mubr.bf16.gmra.mrb[12].mxu1 %v1355_v23 }
  0x3b   :  { %1267 = vmatprep.mubr.bf16.mxu0 %v1356_v24  ;;  %1299 = vmatprep.mubr.bf16.mxu1 %v1357_v25 }
  0x42   :  { %1268 = vmatmul.mubr.bf16.gmra.mrb[16].mxu0 %v1358_v26  ;;  %1300 = vmatmul.mubr.bf16.gmra.mrb[16].mxu1 %v1359_v27 }
  0x43   :  { %1271 = vmatprep.mubr.bf16.mxu0 %v1360_v28  ;;  %1303 = vmatprep.mubr.bf16.mxu1 %v1361_v29 }
  0x4a   :  { %1272 = vmatmul.mubr.bf16.gmra.mrb[20].mxu0 %v1362_v30  ;;  %1304 = vmatmul.mubr.bf16.gmra.mrb[20].mxu1 %v1363_v31 }
  0x4b   :  { %1275 = vmatprep.mubr.bf16.mxu0 %v1364_v32  ;;  %1307 = vmatprep.mubr.bf16.mxu1 %v1365_v33 }
  0x52   :  { %1276 = vmatmul.mubr.bf16.gmra.mrb[24].mxu0 %v1366_v34  ;;  %1308 = vmatmul.mubr.bf16.gmra.mrb[24].mxu1 %v1367_v35 }
  0x53   :  { %1279 = vmatprep.mubr.bf16.mxu0 %v1368_v36  ;;  %1311 = vmatprep.mubr.bf16.mxu1 %v1369_v37 }
  0x5a   :  { %1280 = vmatmul.mubr.bf16.gmra.mrb[28].mxu0 %v1370_v38  ;;  %1312 = vmatmul.mubr.bf16.gmra.mrb[28].mxu1 %v1371_v39 }
  0xf5   :  { %v1253_v40 = vpop.f32.mrb[0].mxu0  ;;  %v1285_v42 = vpop.f32.mrb[0].mxu1 }
  0xf6   :  { %v501_v43 = vpop.f32.mrb[1].mxu0  ;;  %v629_v44 = vpop.f32.mrb[1].mxu1  ;;  %v960_v47 = vadd.f32 %v1253_v40, %v1515_v41  ;;  %v992_v48 = vadd.f32 %v1285_v42, %v1515_v41 }
  0xf7   :  { %v1254_v45 = vpop.f32.mrb[2].mxu0  ;;  %v1286_v46 = vpop.f32.mrb[2].mxu1  ;;  %v958_v51 = vadd.f32 %v1515_v41, %v501_v43  ;;  %v990_v52 = vadd.f32 %v1515_v41, %v629_v44 }
  0xf8   :  { %v504_v49 = vpop.f32.mrb[3].mxu0  ;;  %v632_v50 = vpop.f32.mrb[3].mxu1  ;;  %v1024_v53 = vmax.f32 %v960_v47, 0.0  ;;  %v1056_v54 = vmax.f32 %v992_v48, 0.0  ;;  %v961_v55 = vadd.f32 %v1254_v45, %v1515_v41  ;;  %v993_v56 = vadd.f32 %v1286_v46, %v1515_v41 }
  0xf9   :  { %v1022_v57 = vmax.f32 %v958_v51, 0.0  ;;  %v1054_v58 = vmax.f32 %v990_v52, 0.0  ;;  %v959_v59 = vadd.f32 %v1515_v41, %v504_v49  ;;  %v991_v60 = vadd.f32 %v1515_v41, %v632_v50 }
  0xfa   :  { %1088 = vst [vmem:[%s1776_s3 + $0x10] sm:$0xff] %v1024_v53  ;;  %1120 = vst [vmem:[%s1776_s3 + $0x110] sm:$0xff] %v1056_v54  ;;  %v1025_v61 = vmax.f32 %v961_v55, 0.0  ;;  %v1057_v62 = vmax.f32 %v993_v56, 0.0 }
  0xfb   :  { %1086 = vst [vmem:[%s1776_s3] sm:$0xff] %v1022_v57  ;;  %1118 = vst [vmem:[%s1776_s3 + $0x100] sm:$0xff] %v1054_v58  ;;  %v1023_v63 = vmax.f32 %v959_v59, 0.0  ;;  %v1055_v0 = vmax.f32 %v991_v60, 0.0 }
  0xfc   :  { %1089 = vst [vmem:[%s1776_s3 + $0x18] sm:$0xff] %v1025_v61  ;;  %1121 = vst [vmem:[%s1776_s3 + $0x118] sm:$0xff] %v1057_v62 }
  0xfd   :  { %v1257_v1 = vpop.f32.mrb[4].mxu0  ;;  %v1289_v2 = vpop.f32.mrb[4].mxu1  ;;  %1087 = vst [vmem:[%s1776_s3 + $0x8] sm:$0xff] %v1023_v63  ;;  %1119 = vst [vmem:[%s1776_s3 + $0x108] sm:$0xff] %v1055_v0 }
  0xfe   :  { %v517_v3 = vpop.f32.mrb[5].mxu0  ;;  %v645_v4 = vpop.f32.mrb[5].mxu1  ;;  %v964_v7 = vadd.f32 %v1257_v1, %v1515_v41  ;;  %v996_v8 = vadd.f32 %v1289_v2, %v1515_v41 }
  0xff   :  { %v1258_v5 = vpop.f32.mrb[6].mxu0  ;;  %v1290_v6 = vpop.f32.mrb[6].mxu1  ;;  %v962_v11 = vadd.f32 %v1515_v41, %v517_v3  ;;  %v994_v12 = vadd.f32 %v1515_v41, %v645_v4 }
 0x100   :  { %v520_v9 = vpop.f32.mrb[7].mxu0  ;;  %v648_v10 = vpop.f32.mrb[7].mxu1  ;;  %v1028_v13 = vmax.f32 %v964_v7, 0.0  ;;  %v1060_v14 = vmax.f32 %v996_v8, 0.0  ;;  %v965_v15 = vadd.f32 %v1258_v5, %v1515_v41  ;;  %v997_v16 = vadd.f32 %v1290_v6, %v1515_v41 }
 0x101   :  { %v1026_v17 = vmax.f32 %v962_v11, 0.0  ;;  %v1058_v18 = vmax.f32 %v994_v12, 0.0  ;;  %v963_v19 = vadd.f32 %v1515_v41, %v520_v9  ;;  %v995_v20 = vadd.f32 %v1515_v41, %v648_v10 }
 0x102   :  { %1092 = vst [vmem:[%s1776_s3 + $0x30] sm:$0xff] %v1028_v13  ;;  %1124 = vst [vmem:[%s1776_s3 + $0x130] sm:$0xff] %v1060_v14  ;;  %v1029_v21 = vmax.f32 %v965_v15, 0.0  ;;  %v1061_v22 = vmax.f32 %v997_v16, 0.0 }
 0x103   :  { %1090 = vst [vmem:[%s1776_s3 + $0x20] sm:$0xff] %v1026_v17  ;;  %1122 = vst [vmem:[%s1776_s3 + $0x120] sm:$0xff] %v1058_v18  ;;  %v1027_v23 = vmax.f32 %v963_v19, 0.0  ;;  %v1059_v24 = vmax.f32 %v995_v20, 0.0 }
 0x104   :  { %1093 = vst [vmem:[%s1776_s3 + $0x38] sm:$0xff] %v1029_v21  ;;  %1125 = vst [vmem:[%s1776_s3 + $0x138] sm:$0xff] %v1061_v22 }
 0x105   :  { %v1261_v25 = vpop.f32.mrb[8].mxu0  ;;  %v1293_v26 = vpop.f32.mrb[8].mxu1  ;;  %1091 = vst [vmem:[%s1776_s3 + $0x28] sm:$0xff] %v1027_v23  ;;  %1123 = vst [vmem:[%s1776_s3 + $0x128] sm:$0xff] %v1059_v24 }
 0x106   :  { %v533_v27 = vpop.f32.mrb[9].mxu0  ;;  %v661_v28 = vpop.f32.mrb[9].mxu1  ;;  %v968_v31 = vadd.f32 %v1261_v25, %v1515_v41  ;;  %v1000_v32 = vadd.f32 %v1293_v26, %v1515_v41 }
 0x107   :  { %v1262_v29 = vpop.f32.mrb[10].mxu0  ;;  %v1294_v30 = vpop.f32.mrb[10].mxu1  ;;  %v966_v35 = vadd.f32 %v1515_v41, %v533_v27  ;;  %v998_v36 = vadd.f32 %v1515_v41, %v661_v28 }
 0x108   :  { %v536_v33 = vpop.f32.mrb[11].mxu0  ;;  %v664_v34 = vpop.f32.mrb[11].mxu1  ;;  %v1032_v37 = vmax.f32 %v968_v31, 0.0  ;;  %v1064_v38 = vmax.f32 %v1000_v32, 0.0  ;;  %v969_v39 = vadd.f32 %v1262_v29, %v1515_v41  ;;  %v1001_v40 = vadd.f32 %v1294_v30, %v1515_v41 }
 0x109   :  { %v1030_v42 = vmax.f32 %v966_v35, 0.0  ;;  %v1062_v43 = vmax.f32 %v998_v36, 0.0  ;;  %v967_v44 = vadd.f32 %v1515_v41, %v536_v33  ;;  %v999_v45 = vadd.f32 %v1515_v41, %v664_v34 }
 0x10a   :  { %1096 = vst [vmem:[%s1776_s3 + $0x50] sm:$0xff] %v1032_v37  ;;  %1128 = vst [vmem:[%s1776_s3 + $0x150] sm:$0xff] %v1064_v38  ;;  %v1033_v46 = vmax.f32 %v969_v39, 0.0  ;;  %v1065_v47 = vmax.f32 %v1001_v40, 0.0 }
 0x10b   :  { %1094 = vst [vmem:[%s1776_s3 + $0x40] sm:$0xff] %v1030_v42  ;;  %1126 = vst [vmem:[%s1776_s3 + $0x140] sm:$0xff] %v1062_v43  ;;  %v1031_v48 = vmax.f32 %v967_v44, 0.0  ;;  %v1063_v49 = vmax.f32 %v999_v45, 0.0 }
 0x10c   :  { %1097 = vst [vmem:[%s1776_s3 + $0x58] sm:$0xff] %v1033_v46  ;;  %1129 = vst [vmem:[%s1776_s3 + $0x158] sm:$0xff] %v1065_v47 }
 0x10d   :  { %v1265_v50 = vpop.f32.mrb[12].mxu0  ;;  %v1297_v51 = vpop.f32.mrb[12].mxu1  ;;  %1095 = vst [vmem:[%s1776_s3 + $0x48] sm:$0xff] %v1031_v48  ;;  %1127 = vst [vmem:[%s1776_s3 + $0x148] sm:$0xff] %v1063_v49 }
 0x10e   :  { %v549_v52 = vpop.f32.mrb[13].mxu0  ;;  %v677_v53 = vpop.f32.mrb[13].mxu1  ;;  %v972_v56 = vadd.f32 %v1265_v50, %v1515_v41  ;;  %v1004_v57 = vadd.f32 %v1297_v51, %v1515_v41 }
 0x10f   :  { %v1266_v54 = vpop.f32.mrb[14].mxu0  ;;  %v1298_v55 = vpop.f32.mrb[14].mxu1  ;;  %v970_v60 = vadd.f32 %v1515_v41, %v549_v52  ;;  %v1002_v61 = vadd.f32 %v1515_v41, %v677_v53 }
 0x110   :  { %v552_v58 = vpop.f32.mrb[15].mxu0  ;;  %v680_v59 = vpop.f32.mrb[15].mxu1  ;;  %v1036_v62 = vmax.f32 %v972_v56, 0.0  ;;  %v1068_v63 = vmax.f32 %v1004_v57, 0.0  ;;  %v973_v0 = vadd.f32 %v1266_v54, %v1515_v41  ;;  %v1005_v1 = vadd.f32 %v1298_v55, %v1515_v41 }
 0x111   :  { %v1034_v2 = vmax.f32 %v970_v60, 0.0  ;;  %v1066_v3 = vmax.f32 %v1002_v61, 0.0  ;;  %v971_v4 = vadd.f32 %v1515_v41, %v552_v58  ;;  %v1003_v5 = vadd.f32 %v1515_v41, %v680_v59 }
 0x112   :  { %1100 = vst [vmem:[%s1776_s3 + $0x70] sm:$0xff] %v1036_v62  ;;  %1132 = vst [vmem:[%s1776_s3 + $0x170] sm:$0xff] %v1068_v63  ;;  %v1037_v6 = vmax.f32 %v973_v0, 0.0  ;;  %v1069_v7 = vmax.f32 %v1005_v1, 0.0 }
 0x113   :  { %1098 = vst [vmem:[%s1776_s3 + $0x60] sm:$0xff] %v1034_v2  ;;  %1130 = vst [vmem:[%s1776_s3 + $0x160] sm:$0xff] %v1066_v3  ;;  %v1035_v8 = vmax.f32 %v971_v4, 0.0  ;;  %v1067_v9 = vmax.f32 %v1003_v5, 0.0 }
 0x114   :  { %1101 = vst [vmem:[%s1776_s3 + $0x78] sm:$0xff] %v1037_v6  ;;  %1133 = vst [vmem:[%s1776_s3 + $0x178] sm:$0xff] %v1069_v7 }
 0x115   :  { %v1269_v10 = vpop.f32.mrb[16].mxu0  ;;  %v1301_v11 = vpop.f32.mrb[16].mxu1  ;;  %1099 = vst [vmem:[%s1776_s3 + $0x68] sm:$0xff] %v1035_v8  ;;  %1131 = vst [vmem:[%s1776_s3 + $0x168] sm:$0xff] %v1067_v9 }
 0x116   :  { %v565_v12 = vpop.f32.mrb[17].mxu0  ;;  %v693_v13 = vpop.f32.mrb[17].mxu1  ;;  %v976_v16 = vadd.f32 %v1269_v10, %v1515_v41  ;;  %v1008_v17 = vadd.f32 %v1301_v11, %v1515_v41 }
 0x117   :  { %v1270_v14 = vpop.f32.mrb[18].mxu0  ;;  %v1302_v15 = vpop.f32.mrb[18].mxu1  ;;  %v974_v20 = vadd.f32 %v1515_v41, %v565_v12  ;;  %v1006_v21 = vadd.f32 %v1515_v41, %v693_v13 }
 0x118   :  { %v568_v18 = vpop.f32.mrb[19].mxu0  ;;  %v696_v19 = vpop.f32.mrb[19].mxu1  ;;  %v1040_v22 = vmax.f32 %v976_v16, 0.0  ;;  %v1072_v23 = vmax.f32 %v1008_v17, 0.0  ;;  %v977_v24 = vadd.f32 %v1270_v14, %v1515_v41  ;;  %v1009_v25 = vadd.f32 %v1302_v15, %v1515_v41 }
 0x119   :  { %v1038_v26 = vmax.f32 %v974_v20, 0.0  ;;  %v1070_v27 = vmax.f32 %v1006_v21, 0.0  ;;  %v975_v28 = vadd.f32 %v1515_v41, %v568_v18  ;;  %v1007_v29 = vadd.f32 %v1515_v41, %v696_v19 }
 0x11a   :  { %1104 = vst [vmem:[%s1776_s3 + $0x90] sm:$0xff] %v1040_v22  ;;  %1136 = vst [vmem:[%s1776_s3 + $0x190] sm:$0xff] %v1072_v23  ;;  %v1041_v30 = vmax.f32 %v977_v24, 0.0  ;;  %v1073_v31 = vmax.f32 %v1009_v25, 0.0 }
 0x11b   :  { %1102 = vst [vmem:[%s1776_s3 + $0x80] sm:$0xff] %v1038_v26  ;;  %1134 = vst [vmem:[%s1776_s3 + $0x180] sm:$0xff] %v1070_v27  ;;  %v1039_v32 = vmax.f32 %v975_v28, 0.0  ;;  %v1071_v33 = vmax.f32 %v1007_v29, 0.0 }
 0x11c   :  { %1105 = vst [vmem:[%s1776_s3 + $0x98] sm:$0xff] %v1041_v30  ;;  %1137 = vst [vmem:[%s1776_s3 + $0x198] sm:$0xff] %v1073_v31 }
 0x11d   :  { %v1273_v34 = vpop.f32.mrb[20].mxu0  ;;  %v1305_v35 = vpop.f32.mrb[20].mxu1  ;;  %1103 = vst [vmem:[%s1776_s3 + $0x88] sm:$0xff] %v1039_v32  ;;  %1135 = vst [vmem:[%s1776_s3 + $0x188] sm:$0xff] %v1071_v33 }
 0x11e   :  { %v581_v36 = vpop.f32.mrb[21].mxu0  ;;  %v709_v37 = vpop.f32.mrb[21].mxu1  ;;  %v980_v40 = vadd.f32 %v1273_v34, %v1515_v41  ;;  %v1012_v42 = vadd.f32 %v1305_v35, %v1515_v41 }
 0x11f   :  { %v1274_v38 = vpop.f32.mrb[22].mxu0  ;;  %v1306_v39 = vpop.f32.mrb[22].mxu1  ;;  %v978_v45 = vadd.f32 %v1515_v41, %v581_v36  ;;  %v1010_v46 = vadd.f32 %v1515_v41, %v709_v37 }
 0x120   :  { %v584_v43 = vpop.f32.mrb[23].mxu0  ;;  %v712_v44 = vpop.f32.mrb[23].mxu1  ;;  %v1044_v47 = vmax.f32 %v980_v40, 0.0  ;;  %v1076_v48 = vmax.f32 %v1012_v42, 0.0  ;;  %v981_v49 = vadd.f32 %v1274_v38, %v1515_v41  ;;  %v1013_v50 = vadd.f32 %v1306_v39, %v1515_v41 }
 0x121   :  { %v1042_v51 = vmax.f32 %v978_v45, 0.0  ;;  %v1074_v52 = vmax.f32 %v1010_v46, 0.0  ;;  %v979_v53 = vadd.f32 %v1515_v41, %v584_v43  ;;  %v1011_v54 = vadd.f32 %v1515_v41, %v712_v44 }
 0x122   :  { %1108 = vst [vmem:[%s1776_s3 + $0xb0] sm:$0xff] %v1044_v47  ;;  %1140 = vst [vmem:[%s1776_s3 + $0x1b0] sm:$0xff] %v1076_v48  ;;  %v1045_v55 = vmax.f32 %v981_v49, 0.0  ;;  %v1077_v56 = vmax.f32 %v1013_v50, 0.0 }
 0x123   :  { %1106 = vst [vmem:[%s1776_s3 + $0xa0] sm:$0xff] %v1042_v51  ;;  %1138 = vst [vmem:[%s1776_s3 + $0x1a0] sm:$0xff] %v1074_v52  ;;  %v1043_v57 = vmax.f32 %v979_v53, 0.0  ;;  %v1075_v58 = vmax.f32 %v1011_v54, 0.0 }
 0x124   :  { %1109 = vst [vmem:[%s1776_s3 + $0xb8] sm:$0xff] %v1045_v55  ;;  %1141 = vst [vmem:[%s1776_s3 + $0x1b8] sm:$0xff] %v1077_v56 }
 0x125   :  { %v1277_v59 = vpop.f32.mrb[24].mxu0  ;;  %v1309_v60 = vpop.f32.mrb[24].mxu1  ;;  %1107 = vst [vmem:[%s1776_s3 + $0xa8] sm:$0xff] %v1043_v57  ;;  %1139 = vst [vmem:[%s1776_s3 + $0x1a8] sm:$0xff] %v1075_v58 }
 0x126   :  { %v597_v61 = vpop.f32.mrb[25].mxu0  ;;  %v725_v62 = vpop.f32.mrb[25].mxu1  ;;  %v984_v1 = vadd.f32 %v1277_v59, %v1515_v41  ;;  %v1016_v2 = vadd.f32 %v1309_v60, %v1515_v41 }
 0x127   :  { %v1278_v63 = vpop.f32.mrb[26].mxu0  ;;  %v1310_v0 = vpop.f32.mrb[26].mxu1  ;;  %v982_v5 = vadd.f32 %v1515_v41, %v597_v61  ;;  %v1014_v6 = vadd.f32 %v1515_v41, %v725_v62 }
 0x128   :  { %v600_v3 = vpop.f32.mrb[27].mxu0  ;;  %v728_v4 = vpop.f32.mrb[27].mxu1  ;;  %v1048_v7 = vmax.f32 %v984_v1, 0.0  ;;  %v1080_v8 = vmax.f32 %v1016_v2, 0.0  ;;  %v985_v9 = vadd.f32 %v1278_v63, %v1515_v41  ;;  %v1017_v10 = vadd.f32 %v1310_v0, %v1515_v41 }
 0x129   :  { %v1046_v11 = vmax.f32 %v982_v5, 0.0  ;;  %v1078_v12 = vmax.f32 %v1014_v6, 0.0  ;;  %v983_v13 = vadd.f32 %v1515_v41, %v600_v3  ;;  %v1015_v14 = vadd.f32 %v1515_v41, %v728_v4 }
 0x12a   :  { %1112 = vst [vmem:[%s1776_s3 + $0xd0] sm:$0xff] %v1048_v7  ;;  %1144 = vst [vmem:[%s1776_s3 + $0x1d0] sm:$0xff] %v1080_v8  ;;  %v1049_v15 = vmax.f32 %v985_v9, 0.0  ;;  %v1081_v16 = vmax.f32 %v1017_v10, 0.0 }
 0x12b   :  { %1110 = vst [vmem:[%s1776_s3 + $0xc0] sm:$0xff] %v1046_v11  ;;  %1142 = vst [vmem:[%s1776_s3 + $0x1c0] sm:$0xff] %v1078_v12  ;;  %v1047_v17 = vmax.f32 %v983_v13, 0.0  ;;  %v1079_v18 = vmax.f32 %v1015_v14, 0.0 }
 0x12c   :  { %1113 = vst [vmem:[%s1776_s3 + $0xd8] sm:$0xff] %v1049_v15  ;;  %1145 = vst [vmem:[%s1776_s3 + $0x1d8] sm:$0xff] %v1081_v16 }
 0x12d   :  { %v1281_v19 = vpop.f32.mrb[28].mxu0  ;;  %v1313_v20 = vpop.f32.mrb[28].mxu1  ;;  %1111 = vst [vmem:[%s1776_s3 + $0xc8] sm:$0xff] %v1047_v17  ;;  %1143 = vst [vmem:[%s1776_s3 + $0x1c8] sm:$0xff] %v1079_v18 }
 0x12e   :  { %v613_v21 = vpop.f32.mrb[29].mxu0  ;;  %v741_v22 = vpop.f32.mrb[29].mxu1  ;;  %v988_v25 = vadd.f32 %v1281_v19, %v1515_v41  ;;  %v1020_v26 = vadd.f32 %v1313_v20, %v1515_v41 }
 0x12f   :  { %v1282_v23 = vpop.f32.mrb[30].mxu0  ;;  %v1314_v24 = vpop.f32.mrb[30].mxu1  ;;  %v986_v29 = vadd.f32 %v1515_v41, %v613_v21  ;;  %v1018_v30 = vadd.f32 %v1515_v41, %v741_v22 }
 0x130   :  { %v616_v27 = vpop.f32.mrb[31].mxu0  ;;  %v744_v28 = vpop.f32.mrb[31].mxu1  ;;  %v1052_v31 = vmax.f32 %v988_v25, 0.0  ;;  %v1084_v32 = vmax.f32 %v1020_v26, 0.0  ;;  %v989_v33 = vadd.f32 %v1282_v23, %v1515_v41  ;;  %v1021_v34 = vadd.f32 %v1314_v24, %v1515_v41 }
 0x131   :  { %v1050_v35 = vmax.f32 %v986_v29, 0.0  ;;  %v1082_v36 = vmax.f32 %v1018_v30, 0.0  ;;  %v987_v37 = vadd.f32 %v1515_v41, %v616_v27  ;;  %v1019_v38 = vadd.f32 %v1515_v41, %v744_v28 }
 0x132   :  { %1116 = vst [vmem:[%s1776_s3 + $0xf0] sm:$0xff] %v1052_v31  ;;  %1148 = vst [vmem:[%s1776_s3 + $0x1f0] sm:$0xff] %v1084_v32  ;;  %v1053_v39 = vmax.f32 %v989_v33, 0.0  ;;  %v1085_v40 = vmax.f32 %v1021_v34, 0.0 }
 0x133   :  { %1114 = vst [vmem:[%s1776_s3 + $0xe0] sm:$0xff] %v1050_v35  ;;  %1146 = vst [vmem:[%s1776_s3 + $0x1e0] sm:$0xff] %v1082_v36  ;;  %v1051_v42 = vmax.f32 %v987_v37, 0.0  ;;  %v1083_v41 = vmax.f32 %v1019_v38, 0.0 }
 0x134   :  { %1117 = vst [vmem:[%s1776_s3 + $0xf8] sm:$0xff] %v1053_v39  ;;  %1149 = vst [vmem:[%s1776_s3 + $0x1f8] sm:$0xff] %v1085_v40 }
 0x135   :  { %1115 = vst [vmem:[%s1776_s3 + $0xe8] sm:$0xff] %v1051_v42  ;;  %1147 = vst [vmem:[%s1776_s3 + $0x1e8] sm:$0xff] %v1083_v41 }

// kernel: pspnet_forward.10
= control target key start
LH: loop header
LB: loop body
LE: loop exit
PB: predicated region body
PF: predicated region fallthrough
CT: control target
= control target key end

     0   :  { %s821_s1 = inlined_call_operand.vmem [shape: bf16[256,128], index: 1, kind: input, shape index: {}]   ;;  %s822_s0 = inlined_call_operand.vmem [shape: bf16[128,256], index: 0, kind: input, shape index: {}]   ;;  %s823_s2 = inlined_call_operand.vmem [shape: f32[1,128], index: 2, kind: input, shape index: {}]   ;;  %s824_s3 = inlined_call_operand.vmem [shape: f32[128,128], index: 3, kind: output, shape index: {}]  }
   0x1   :  { %v596_v0 = vld [vmem:[%s821_s1 + $0x40] sm:$0xff]   ;;  %v598_v2 = vld [vmem:[%s821_s1 + $0x48] sm:$0xff]   ;;  %v600_v4 = vld [vmem:[%s821_s1 + $0x50] sm:$0xff]  }
   0x2   :  { %v597_v1 = vld [vmem:[%s821_s1] sm:$0xff]   ;;  %515 = vmatprep.subr.bf16.mxu0 %v596_v0  ;;  %579 = vmatprep.subr.bf16.mxu1 %v596_v0  ;;  %v599_v3 = vld [vmem:[%s821_s1 + $0x8] sm:$0xff]   ;;  %v601_v5 = vld [vmem:[%s821_s1 + $0x10] sm:$0xff]  }
   0x3   :  { %516 = vmatpush3.bf16.msra.mxu0 %v597_v1  ;;  %587 = vmatpush3.bf16.msra.mxu1 %v597_v1  ;;  %v602_v6 = vld [vmem:[%s821_s1 + $0x58] sm:$0xff]   ;;  %v604_v8 = vld [vmem:[%s821_s1 + $0x60] sm:$0xff]   ;;  %v606_v10 = vld [vmem:[%s821_s1 + $0x68] sm:$0xff]  }
   0x4   :  { %517 = vmatprep.subr.bf16.mxu0 %v598_v2  ;;  %580 = vmatprep.subr.bf16.mxu1 %v598_v2  ;;  %v603_v7 = vld [vmem:[%s821_s1 + $0x18] sm:$0xff]   ;;  %v605_v9 = vld [vmem:[%s821_s1 + $0x20] sm:$0xff]   ;;  %v607_v13 = vld [vmem:[%s821_s1 + $0x28] sm:$0xff]  }
   0x5   :  { %v614_v11 = vld [vmem:[%s822_s0 + $0x4] ss:$8 sps:$4 sm:$0xff]   ;;  %v608_v14 = vld [vmem:[%s821_s1 + $0x70] sm:$0xff]   ;;  %v610_v16 = vld [vmem:[%s821_s1 + $0x78] sm:$0xff]  }
   0x6   :  { %v617_v12 = vld [vmem:[%s822_s0 + $0x44] ss:$8 sps:$4 sm:$0xff]   ;;  %307 = vmatprep.mubr.bf16.mxu0 %v614_v11  ;;  %v609_v15 = vld [vmem:[%s821_s1 + $0x30] sm:$0xff]   ;;  %v611_v17 = vld [vmem:[%s821_s1 + $0x38] sm:$0xff]  }
   0x7   :  { %518 = vmatpush3.bf16.msra.mxu0 %v599_v3  ;;  %588 = vmatpush3.bf16.msra.mxu1 %v599_v3  ;;  %v612_v18 = vld [vmem:[%s822_s0] ss:$8 sps:$4 sm:$0xff]   ;;  %v618_v20 = vld [vmem:[%s822_s0 + $0x14] ss:$8 sps:$4 sm:$0xff]   ;;  %v622_v22 = vld [vmem:[%s822_s0 + $0x10] ss:$8 sps:$4 sm:$0xff]  }
   0x8   :  { %519 = vmatprep.subr.bf16.mxu0 %v600_v4  ;;  %581 = vmatprep.subr.bf16.mxu1 %v600_v4  ;;  %v615_v19 = vld [vmem:[%s822_s0 + $0x40] ss:$8 sps:$4 sm:$0xff]   ;;  %v620_v21 = vld [vmem:[%s822_s0 + $0x54] ss:$8 sps:$4 sm:$0xff]   ;;  %v623_v23 = vld [vmem:[%s822_s0 + $0x50] ss:$8 sps:$4 sm:$0xff]  }
   0x9   :  { %339 = vmatprep.mubr.bf16.mxu1 %v617_v12  ;;  %v624_v24 = vld [vmem:[%s822_s0 + $0x24] ss:$8 sps:$4 sm:$0xff]   ;;  %v628_v26 = vld [vmem:[%s822_s0 + $0x20] ss:$8 sps:$4 sm:$0xff]   ;;  %v630_v28 = vld [vmem:[%s822_s0 + $0x34] ss:$8 sps:$4 sm:$0xff]  }
   0xa   :  { %v626_v25 = vld [vmem:[%s822_s0 + $0x64] ss:$8 sps:$4 sm:$0xff]   ;;  %v629_v27 = vld [vmem:[%s822_s0 + $0x60] ss:$8 sps:$4 sm:$0xff]   ;;  %v632_v29 = vld [vmem:[%s822_s0 + $0x74] ss:$8 sps:$4 sm:$0xff]  }
   0xb   :  { %520 = vmatpush3.bf16.msra.mxu0 %v601_v5  ;;  %589 = vmatpush3.bf16.msra.mxu1 %v601_v5  ;;  %v634_v30 = vld [vmem:[%s822_s0 + $0x30] ss:$8 sps:$4 sm:$0xff]   ;;  %v755_v40 = vld [vmem:[%s823_s2] ss:$0 sm:$0xff] }
   0xc   :  { %521 = vmatprep.subr.bf16.mxu0 %v602_v6  ;;  %582 = vmatprep.subr.bf16.mxu1 %v602_v6  ;;  %v635_v31 = vld [vmem:[%s822_s0 + $0x70] ss:$8 sps:$4 sm:$0xff]  }
   0xf   :  { %522 = vmatpush3.bf16.msra.mxu0 %v603_v7  ;;  %590 = vmatpush3.bf16.msra.mxu1 %v603_v7 }
  0x10   :  { %523 = vmatprep.subr.bf16.mxu0 %v604_v8  ;;  %583 = vmatprep.subr.bf16.mxu1 %v604_v8 }
  0x13   :  { %524 = vmatpush3.bf16.msra.mxu0 %v605_v9  ;;  %591 = vmatpush3.bf16.msra.mxu1 %v605_v9 }
  0x14   :  { %525 = vmatprep.subr.bf16.mxu0 %v606_v10  ;;  %584 = vmatprep.subr.bf16.mxu1 %v606_v10 }
  0x17   :  { %526 = vmatpush3.bf16.msra.mxu0 %v607_v13  ;;  %592 = vmatpush3.bf16.msra.mxu1 %v607_v13 }
  0x18   :  { %527 = vmatprep.subr.bf16.mxu0 %v608_v14  ;;  %585 = vmatprep.subr.bf16.mxu1 %v608_v14 }
  0x1b   :  { %528 = vmatpush3.bf16.msra.mxu0 %v609_v15  ;;  %593 = vmatpush3.bf16.msra.mxu1 %v609_v15 }
  0x1c   :  { %529 = vmatprep.subr.bf16.mxu0 %v610_v16  ;;  %586 = vmatprep.subr.bf16.mxu1 %v610_v16 }
  0x1f   :  { %530 = vmatpush3.bf16.msra.mxu0 %v611_v17  ;;  %594 = vmatpush3.bf16.msra.mxu1 %v611_v17 }
  0x22   :  { %308 = vmatmul.mubr.bf16.vlgmr.msra.gmra.mrb[0].mxu0 %v612_v18  ;;  %340 = vmatmul.mubr.bf16.vlgmr.msra.gmra.mrb[0].mxu1 %v615_v19 }
  0x23   :  { %315 = vmatprep.mubr.bf16.mxu0 %v618_v20  ;;  %347 = vmatprep.mubr.bf16.mxu1 %v620_v21 }
  0x2a   :  { %316 = vmatmul.mubr.bf16.gmra.mrb[4].mxu0 %v622_v22  ;;  %348 = vmatmul.mubr.bf16.gmra.mrb[4].mxu1 %v623_v23 }
  0x2b   :  { %323 = vmatprep.mubr.bf16.mxu0 %v624_v24  ;;  %355 = vmatprep.mubr.bf16.mxu1 %v626_v25 }
  0x32   :  { %324 = vmatmul.mubr.bf16.gmra.mrb[8].mxu0 %v628_v26  ;;  %356 = vmatmul.mubr.bf16.gmra.mrb[8].mxu1 %v629_v27 }
  0x33   :  { %331 = vmatprep.mubr.bf16.mxu0 %v630_v28  ;;  %363 = vmatprep.mubr.bf16.mxu1 %v632_v29 }
  0x3a   :  { %332 = vmatmul.mubr.bf16.gmra.mrb[12].mxu0 %v634_v30  ;;  %364 = vmatmul.mubr.bf16.gmra.mrb[12].mxu1 %v635_v31 }
  0xf5   :  { %v531_v32 = vpop.f32.mrb[0].mxu0  ;;  %v555_v33 = vpop.f32.mrb[0].mxu1 }
  0xf6   :  { %v532_v34 = vpop.f32.mrb[1].mxu0  ;;  %v556_v35 = vpop.f32.mrb[1].mxu1 }
  0xf7   :  { %v533_v36 = vadd.f32 %v532_v34, %v531_v32  ;;  %v557_v37 = vadd.f32 %v556_v35, %v555_v33  ;;  %v534_v38 = vpop.f32.mrb[2].mxu0  ;;  %v558_v39 = vpop.f32.mrb[2].mxu1 }
  0xf8   :  { %v535_v41 = vpop.f32.mrb[3].mxu0  ;;  %v559_v42 = vpop.f32.mrb[3].mxu1 }
  0xf9   :  { %v536_v43 = vadd.f32 %v535_v41, %v534_v38  ;;  %v560_v44 = vadd.f32 %v559_v42, %v558_v39  ;;  %v430_v45 = vadd.f32 %v533_v36, %v755_v40  ;;  %v438_v46 = vadd.f32 %v557_v37, %v755_v40 }
  0xfb   :  { %v446_v47 = vmax.f32 %v430_v45, 0.0  ;;  %v454_v48 = vmax.f32 %v438_v46, 0.0  ;;  %v431_v49 = vadd.f32 %v536_v43, %v755_v40  ;;  %v439_v50 = vadd.f32 %v560_v44, %v755_v40 }
  0xfd   :  { %v537_v51 = vpop.f32.mrb[4].mxu0  ;;  %v561_v52 = vpop.f32.mrb[4].mxu1  ;;  %462 = vst [vmem:[%s824_s3] sm:$0xff] %v446_v47  ;;  %470 = vst [vmem:[%s824_s3 + $0x40] sm:$0xff] %v454_v48  ;;  %v447_v55 = vmax.f32 %v431_v49, 0.0  ;;  %v455_v56 = vmax.f32 %v439_v50, 0.0 }
  0xfe   :  { %v538_v53 = vpop.f32.mrb[5].mxu0  ;;  %v562_v54 = vpop.f32.mrb[5].mxu1 }
  0xff   :  { %v539_v57 = vadd.f32 %v538_v53, %v537_v51  ;;  %v563_v58 = vadd.f32 %v562_v54, %v561_v52  ;;  %v540_v59 = vpop.f32.mrb[6].mxu0  ;;  %v564_v60 = vpop.f32.mrb[6].mxu1  ;;  %463 = vst [vmem:[%s824_s3 + $0x8] sm:$0xff] %v447_v55  ;;  %471 = vst [vmem:[%s824_s3 + $0x48] sm:$0xff] %v455_v56 }
 0x100   :  { %v541_v61 = vpop.f32.mrb[7].mxu0  ;;  %v565_v62 = vpop.f32.mrb[7].mxu1 }
 0x101   :  { %v542_v63 = vadd.f32 %v541_v61, %v540_v59  ;;  %v566_v0 = vadd.f32 %v565_v62, %v564_v60  ;;  %v432_v1 = vadd.f32 %v539_v57, %v755_v40  ;;  %v440_v2 = vadd.f32 %v563_v58, %v755_v40 }
 0x103   :  { %v448_v3 = vmax.f32 %v432_v1, 0.0  ;;  %v456_v4 = vmax.f32 %v440_v2, 0.0  ;;  %v433_v5 = vadd.f32 %v542_v63, %v755_v40  ;;  %v441_v6 = vadd.f32 %v566_v0, %v755_v40 }
 0x105   :  { %v543_v7 = vpop.f32.mrb[8].mxu0  ;;  %v567_v8 = vpop.f32.mrb[8].mxu1  ;;  %464 = vst [vmem:[%s824_s3 + $0x10] sm:$0xff] %v448_v3  ;;  %472 = vst [vmem:[%s824_s3 + $0x50] sm:$0xff] %v456_v4  ;;  %v449_v11 = vmax.f32 %v433_v5, 0.0  ;;  %v457_v12 = vmax.f32 %v441_v6, 0.0 }
 0x106   :  { %v544_v9 = vpop.f32.mrb[9].mxu0  ;;  %v568_v10 = vpop.f32.mrb[9].mxu1 }
 0x107   :  { %v545_v13 = vadd.f32 %v544_v9, %v543_v7  ;;  %v569_v14 = vadd.f32 %v568_v10, %v567_v8  ;;  %v546_v15 = vpop.f32.mrb[10].mxu0  ;;  %v570_v16 = vpop.f32.mrb[10].mxu1  ;;  %465 = vst [vmem:[%s824_s3 + $0x18] sm:$0xff] %v449_v11  ;;  %473 = vst [vmem:[%s824_s3 + $0x58] sm:$0xff] %v457_v12 }
 0x108   :  { %v547_v17 = vpop.f32.mrb[11].mxu0  ;;  %v571_v18 = vpop.f32.mrb[11].mxu1 }
 0x109   :  { %v548_v19 = vadd.f32 %v547_v17, %v546_v15  ;;  %v572_v20 = vadd.f32 %v571_v18, %v570_v16  ;;  %v434_v21 = vadd.f32 %v545_v13, %v755_v40  ;;  %v442_v22 = vadd.f32 %v569_v14, %v755_v40 }
 0x10b   :  { %v450_v23 = vmax.f32 %v434_v21, 0.0  ;;  %v458_v24 = vmax.f32 %v442_v22, 0.0  ;;  %v435_v25 = vadd.f32 %v548_v19, %v755_v40  ;;  %v443_v26 = vadd.f32 %v572_v20, %v755_v40 }
 0x10d   :  { %v549_v27 = vpop.f32.mrb[12].mxu0  ;;  %v573_v28 = vpop.f32.mrb[12].mxu1  ;;  %466 = vst [vmem:[%s824_s3 + $0x20] sm:$0xff] %v450_v23  ;;  %474 = vst [vmem:[%s824_s3 + $0x60] sm:$0xff] %v458_v24  ;;  %v451_v31 = vmax.f32 %v435_v25, 0.0  ;;  %v459_v32 = vmax.f32 %v443_v26, 0.0 }
 0x10e   :  { %v550_v29 = vpop.f32.mrb[13].mxu0  ;;  %v574_v30 = vpop.f32.mrb[13].mxu1 }
 0x10f   :  { %v551_v33 = vadd.f32 %v550_v29, %v549_v27  ;;  %v575_v34 = vadd.f32 %v574_v30, %v573_v28  ;;  %v552_v35 = vpop.f32.mrb[14].mxu0  ;;  %v576_v36 = vpop.f32.mrb[14].mxu1  ;;  %467 = vst [vmem:[%s824_s3 + $0x28] sm:$0xff] %v451_v31  ;;  %475 = vst [vmem:[%s824_s3 + $0x68] sm:$0xff] %v459_v32 }
 0x110   :  { %v553_v37 = vpop.f32.mrb[15].mxu0  ;;  %v577_v38 = vpop.f32.mrb[15].mxu1 }
 0x111   :  { %v554_v39 = vadd.f32 %v553_v37, %v552_v35  ;;  %v578_v41 = vadd.f32 %v577_v38, %v576_v36  ;;  %v436_v42 = vadd.f32 %v551_v33, %v755_v40  ;;  %v444_v43 = vadd.f32 %v575_v34, %v755_v40 }
 0x113   :  { %v452_v44 = vmax.f32 %v436_v42, 0.0  ;;  %v460_v45 = vmax.f32 %v444_v43, 0.0  ;;  %v437_v46 = vadd.f32 %v554_v39, %v755_v40  ;;  %v445_v47 = vadd.f32 %v578_v41, %v755_v40 }
 0x115   :  { %468 = vst [vmem:[%s824_s3 + $0x30] sm:$0xff] %v452_v44  ;;  %476 = vst [vmem:[%s824_s3 + $0x70] sm:$0xff] %v460_v45  ;;  %v453_v48 = vmax.f32 %v437_v46, 0.0  ;;  %v461_v49 = vmax.f32 %v445_v47, 0.0 }
 0x117   :  { %469 = vst [vmem:[%s824_s3 + $0x38] sm:$0xff] %v453_v48  ;;  %477 = vst [vmem:[%s824_s3 + $0x78] sm:$0xff] %v461_v49 }

// kernel: pspnet_forward.11
= control target key start
LH: loop header
LB: loop body
LE: loop exit
PB: predicated region body
PF: predicated region fallthrough
CT: control target
= control target key end

     0   :  { %s1047_s12 = smov 0   ;;  %s1049_s13 = smov 0   ;;  %s1395_s0 = inlined_call_operand.vmem [shape: bf16[128,640], index: 0, kind: input, shape index: {}]   ;;  %s1396_s1 = inlined_call_operand.vmem [shape: bf16[640,128], index: 1, kind: input, shape index: {}]   ;;  %s1397_s2 = inlined_call_operand.vmem [shape: f32[1,128], index: 2, kind: input, shape index: {}]   ;;  %s1398_s3 = inlined_call_operand.vmem [shape: f32[128,128], index: 3, kind: output, shape index: {}]  }
   0x1   :  { %s1051_s14 = smov 0   ;;  %s1053_s15 = smov 0  }
   0x2   :  { %s1055_s16 = smov 0  }
   0x3 LB: > { %s25_s17 = sadd.s32 1, %s1020_s15  ;;  %p48_p1 = scmp.ne.s32.totalorder %s1012_s13, %s1008_s12  ;;  %s1024_s16 = sphi %s1055_s16, %s13_s16   ;;  %s1020_s15 = sphi %s1053_s15, %s1402_s15   ;;  %s1016_s14 = sphi %s1051_s14, %s1401_s14   ;;  %s1012_s13 = sphi %s1049_s13, %s1400_s13   ;;  %s1008_s12 = sphi %s1047_s12, %s1399_s12  }
   0x4   : > { %p26_p0 = scmp.ge.s32.totalorder %s25_s17, 5  ;;  %p49_p2 = scmp.eq.s32.totalorder %s1024_s16, 0 }
   0x5   : > { %s41_s19 = sadd.s32 1, %s1012_s13  ;;  %p835_p5 = scmp.ge.s32.totalorder %s1024_s16, 5 }
   0x6   : > { %s1404_s17 = smov (%p26_p0, %s25_s17), 0  ;;  %p50_p3 = por %p49_p2, %p48_p1 }
   0x7   : > { %s37_s18 = ssub.s32 %s1020_s15, %s1404_s17  ;;  %162 = sbr.rel (%p835_p5) target bundleno = 28 (0x1c), region = 20 }
   0x8   : > { %p39_p4 = scmp.eq.s32.totalorder %s37_s18, 0 }
   0xa   : > { %s1082_s20 = scalar_select %p39_p4, %s1012_s13, %s41_s19  }
   0xe   : > { %165 = sbr.rel (!%p50_p3) target bundleno = 28 (0x1c), region = 24  ;;  %s167_s21 = sand.u32 (%p50_p3), 1, %s1012_s13  }
   0xf   : > { %s837_s22 = sshll.u32 (%p50_p3), %s1020_s15, 2  ;;  %s836_s23 = sshll.u32 (%p50_p3), %s167_s21, 6 }
  0x10   : > { %s1090_s26 = scalar_lea.vmem (%p50_p3), %s1395_s0, %s837_s22  ;;  %s169_s27 = scalar_lea.vmem (%p50_p3), [#allocation2], %s836_s23 }
  0x11   : > { %v190_v0 = vld [vmem:[%s1090_s26] sm:$0xf] (%p50_p3)  ;;  %v192_v1 = vld [vmem:[%s1090_s26 + $0x14] sm:$0xf] (%p50_p3)  ;;  %v194_v2 = vld [vmem:[%s1090_s26 + $0x28] sm:$0xf] (%p50_p3) }
  0x12   : > { %191 = vst [vmem:[%s169_s27] sm:$0xf] (%p50_p3), %v190_v0  ;;  %193 = vst [vmem:[%s169_s27 + $0x4] sm:$0xf] (%p50_p3), %v192_v1  ;;  %v196_v3 = vld [vmem:[%s1090_s26 + $0x3c] sm:$0xf] (%p50_p3) }
  0x13   : > { %v198_v4 = vld [vmem:[%s1090_s26 + $0x50] sm:$0xf] (%p50_p3)  ;;  %195 = vst [vmem:[%s169_s27 + $0x8] sm:$0xf] (%p50_p3), %v194_v2  ;;  %197 = vst [vmem:[%s169_s27 + $0xc] sm:$0xf] (%p50_p3), %v196_v3 }
  0x14   : > { %199 = vst [vmem:[%s169_s27 + $0x10] sm:$0xf] (%p50_p3), %v198_v4  ;;  %v200_v5 = vld [vmem:[%s1090_s26 + $0x64] sm:$0xf] (%p50_p3)  ;;  %v202_v6 = vld [vmem:[%s1090_s26 + $0x78] sm:$0xf] (%p50_p3) }
  0x15   : > { %v204_v7 = vld [vmem:[%s1090_s26 + $0x8c] sm:$0xf]  ;;  %201 = vst [vmem:[%s169_s27 + $0x14] sm:$0xf] %v200_v5  ;;  %203 = vst [vmem:[%s169_s27 + $0x18] sm:$0xf] %v202_v6 }
  0x16   : > { %205 = vst [vmem:[%s169_s27 + $0x1c] sm:$0xf] %v204_v7  ;;  %v206_v8 = vld [vmem:[%s1090_s26 + $0xa0] sm:$0xf]  ;;  %v208_v9 = vld [vmem:[%s1090_s26 + $0xb4] sm:$0xf] }
  0x17   : > { %v210_v10 = vld [vmem:[%s1090_s26 + $0xc8] sm:$0xf]  ;;  %207 = vst [vmem:[%s169_s27 + $0x20] sm:$0xf] %v206_v8  ;;  %209 = vst [vmem:[%s169_s27 + $0x24] sm:$0xf] %v208_v9 }
  0x18   : > { %211 = vst [vmem:[%s169_s27 + $0x28] sm:$0xf] %v210_v10  ;;  %v212_v11 = vld [vmem:[%s1090_s26 + $0xdc] sm:$0xf]  ;;  %v214_v12 = vld [vmem:[%s1090_s26 + $0xf0] sm:$0xf] }
  0x19   : > { %v216_v13 = vld [vmem:[%s1090_s26 + $0x104] sm:$0xf]  ;;  %213 = vst [vmem:[%s169_s27 + $0x2c] sm:$0xf] %v212_v11  ;;  %215 = vst [vmem:[%s169_s27 + $0x30] sm:$0xf] %v214_v12 }
  0x1a   : > { %217 = vst [vmem:[%s169_s27 + $0x34] sm:$0xf] %v216_v13  ;;  %v218_v14 = vld [vmem:[%s1090_s26 + $0x118] sm:$0xf]  ;;  %v220_v15 = vld [vmem:[%s1090_s26 + $0x12c] sm:$0xf] }
  0x1b   : > { %219 = vst [vmem:[%s169_s27 + $0x38] sm:$0xf] %v218_v14  ;;  %221 = vst [vmem:[%s169_s27 + $0x3c] sm:$0xf] %v220_v15 }
  0x1c PF: > { %p838_p6 = scmp.ge.s32.totalorder %s1024_s16, 1  ;;  %p287_p7 = scmp.lt.s32.totalorder %s1024_s16, 6 }
  0x1e   : > { %p288_p8 = pnand %p838_p6, %p287_p7 }
  0x1f   : > { %s294_s28 = sand.u32 (!%p288_p8), 1, %s1008_s12   ;;  %s840_s29 = sshll.u32 (!%p288_p8), %s1016_s14, 4 }
  0x20   : > { %291 = sbr.rel (%p288_p8) target bundleno = 321 (0x141), region = 69  ;;  %s839_s30 = sshll.u32 (!%p288_p8), %s294_s28, 6 }
  0x21   : > { %p333_p9 = scmp.lt.s32.totalorder (!%p288_p8), %s840_s29, 79  ;;  %s1117_s8 = scalar_lea.vmem (!%p288_p8), [#allocation2], %s839_s30 }
  0x22   : > { %p842_p10 = scmp.ne.s32.totalorder (!%p288_p8), %s1016_s14, 0 }
  0x27   : > { %s1406_s29 = smov (!%p333_p9, %s840_s29), 79  ;;  %357 = sbr.rel (%p842_p10) target bundleno = 49 (0x31), region = 77 }
  0x28   : > { %s841_s4 = sshll.u32 %s1406_s29, 2  ;;  %v1026_v16 = vmov (!%p842_p10), 0.0  }
  0x29   : > { %s1115_s7 = scalar_lea.vmem %s1396_s1, %s841_s4  ;;  %358 = vst [vmem:[%s1398_s3] sm:$0xff] (!%p842_p10), %v1026_v16  ;;  %359 = vst [vmem:[%s1398_s3 + $0x8] sm:$0xff] (!%p842_p10), %v1026_v16 }
  0x2a   : > { %360 = vst [vmem:[%s1398_s3 + $0x10] sm:$0xff] (!%p842_p10), %v1026_v16  ;;  %361 = vst [vmem:[%s1398_s3 + $0x18] sm:$0xff] (!%p842_p10), %v1026_v16 }
  0x2b   : > { %362 = vst [vmem:[%s1398_s3 + $0x20] sm:$0xff] (!%p842_p10), %v1026_v16  ;;  %363 = vst [vmem:[%s1398_s3 + $0x28] sm:$0xff] (!%p842_p10), %v1026_v16 }
  0x2c   : > { %364 = vst [vmem:[%s1398_s3 + $0x30] sm:$0xff] (!%p842_p10), %v1026_v16  ;;  %365 = vst [vmem:[%s1398_s3 + $0x38] sm:$0xff] (!%p842_p10), %v1026_v16 }
  0x2d   : > { %366 = vst [vmem:[%s1398_s3 + $0x40] sm:$0xff] (!%p842_p10), %v1026_v16  ;;  %367 = vst [vmem:[%s1398_s3 + $0x48] sm:$0xff] (!%p842_p10), %v1026_v16 }
  0x2e   : > { %368 = vst [vmem:[%s1398_s3 + $0x50] sm:$0xff] %v1026_v16  ;;  %369 = vst [vmem:[%s1398_s3 + $0x58] sm:$0xff] %v1026_v16 }
  0x2f   : > { %370 = vst [vmem:[%s1398_s3 + $0x60] sm:$0xff] %v1026_v16  ;;  %371 = vst [vmem:[%s1398_s3 + $0x68] sm:$0xff] %v1026_v16 }
  0x30   : > { %372 = vst [vmem:[%s1398_s3 + $0x70] sm:$0xff] %v1026_v16  ;;  %373 = vst [vmem:[%s1398_s3 + $0x78] sm:$0xff] %v1026_v16 }
  0x31 PF: > { %v970_v17 = vld [vmem:[%s1115_s7] sm:$0xff]   ;;  %v971_v18 = vld [vmem:[%s1115_s7 + $0x8] sm:$0xff]   ;;  %v972_v19 = vld [vmem:[%s1115_s7 + $0x10] sm:$0xff]   ;;  %p859_p11 = scmp.ne.s32.totalorder %s1016_s14, 4 }
  0x32   : > { %881 = vmatprep.subr.bf16.mxu0 %v970_v17  ;;  %913 = vmatprep.subr.bf16.mxu1 %v970_v17  ;;  %v973_v20 = vld [vmem:[%s1115_s7 + $0x18] sm:$0xff]   ;;  %v978_v21 = vld [vmem:[%s1117_s8] sm:$0xff]   ;;  %v975_v24 = vld [vmem:[%s1115_s7 + $0x28] sm:$0xff]  }
  0x33   : > { %882 = vmatpush3.bf16.msra.mxu0 %v970_v17  ;;  %921 = vmatpush3.bf16.msra.mxu1 %v970_v17  ;;  %v979_v22 = vld [vmem:[%s1117_s8 + $0x20] sm:$0xff]   ;;  %v976_v25 = vld [vmem:[%s1115_s7 + $0x30] sm:$0xff]   ;;  %v977_v26 = vld [vmem:[%s1115_s7 + $0x38] sm:$0xff]  }
  0x34   : > { %883 = vmatprep.subr.bf16.mxu0 %v971_v18  ;;  %914 = vmatprep.subr.bf16.mxu1 %v971_v18  ;;  %v974_v23 = vld [vmem:[%s1115_s7 + $0x20] sm:$0xff]   ;;  %v980_v27 = vld [vmem:[%s1117_s8 + $0x8] sm:$0xff]   ;;  %v982_v29 = vld [vmem:[%s1117_s8 + $0x10] sm:$0xff]  }
  0x35   : > { %897 = vmatprep.mubr.bf16.mxu0 %v978_v21  ;;  %905 = vmatprep.mubr.bf16.mxu1 %v979_v22  ;;  %v981_v28 = vld [vmem:[%s1117_s8 + $0x28] sm:$0xff]   ;;  %v983_v30 = vld [vmem:[%s1117_s8 + $0x30] sm:$0xff]   ;;  %v984_v31 = vld [vmem:[%s1117_s8 + $0x18] sm:$0xff]  }
  0x36   : > { %v985_v32 = vld [vmem:[%s1117_s8 + $0x38] sm:$0xff]   ;;  %v376_v33 = vld [vmem:[%s1398_s3 + $0x10] sm:$0xff]  ;;  %v374_v35 = vld [vmem:[%s1398_s3] sm:$0xff] }
  0x37   : > { %884 = vmatpush3.bf16.msra.mxu0 %v971_v18  ;;  %922 = vmatpush3.bf16.msra.mxu1 %v971_v18  ;;  %v384_v34 = vld [vmem:[%s1398_s3 + $0x50] sm:$0xff]  ;;  %v382_v36 = vld [vmem:[%s1398_s3 + $0x40] sm:$0xff]  ;;  %v377_v39 = vld [vmem:[%s1398_s3 + $0x18] sm:$0xff] }
  0x38   : > { %885 = vmatprep.subr.bf16.mxu0 %v972_v19  ;;  %915 = vmatprep.subr.bf16.mxu1 %v972_v19  ;;  %v385_v40 = vld [vmem:[%s1398_s3 + $0x58] sm:$0xff]  ;;  %v375_v45 = vld [vmem:[%s1398_s3 + $0x8] sm:$0xff]  ;;  %v380_v57 = vld [vmem:[%s1398_s3 + $0x30] sm:$0xff] }
  0x39   : > { %v383_v46 = vld [vmem:[%s1398_s3 + $0x48] sm:$0xff]  ;;  %v388_v58 = vld [vmem:[%s1398_s3 + $0x70] sm:$0xff]  ;;  %v378_v59 = vld [vmem:[%s1398_s3 + $0x20] sm:$0xff] }
  0x3a   : > { %v386_v60 = vld [vmem:[%s1398_s3 + $0x60] sm:$0xff]  ;;  %v381_v63 = vld [vmem:[%s1398_s3 + $0x38] sm:$0xff]  ;;  %v379_v5 = vld [vmem:[%s1398_s3 + $0x28] sm:$0xff] }
  0x3b   : > { %886 = vmatpush3.bf16.msra.mxu0 %v972_v19  ;;  %923 = vmatpush3.bf16.msra.mxu1 %v972_v19  ;;  %v389_v0 = vld [vmem:[%s1398_s3 + $0x78] sm:$0xff]  ;;  %v387_v6 = vld [vmem:[%s1398_s3 + $0x68] sm:$0xff]  ;;  %v860_v18 = vld [vmem:[%s1397_s2] ss:$0 sm:$0xff] (!%p859_p11) }
  0x3c   : > { %887 = vmatprep.subr.bf16.mxu0 %v973_v20  ;;  %916 = vmatprep.subr.bf16.mxu1 %v973_v20 }
  0x3f   : > { %888 = vmatpush3.bf16.msra.mxu0 %v973_v20  ;;  %924 = vmatpush3.bf16.msra.mxu1 %v973_v20 }
  0x40   : > { %889 = vmatprep.subr.bf16.mxu0 %v974_v23  ;;  %917 = vmatprep.subr.bf16.mxu1 %v974_v23 }
  0x43   : > { %890 = vmatpush3.bf16.msra.mxu0 %v974_v23  ;;  %925 = vmatpush3.bf16.msra.mxu1 %v974_v23 }
  0x44   : > { %891 = vmatprep.subr.bf16.mxu0 %v975_v24  ;;  %918 = vmatprep.subr.bf16.mxu1 %v975_v24 }
  0x47   : > { %892 = vmatpush3.bf16.msra.mxu0 %v975_v24  ;;  %926 = vmatpush3.bf16.msra.mxu1 %v975_v24 }
  0x48   : > { %893 = vmatprep.subr.bf16.mxu0 %v976_v25  ;;  %919 = vmatprep.subr.bf16.mxu1 %v976_v25 }
  0x4b   : > { %894 = vmatpush3.bf16.msra.mxu0 %v976_v25  ;;  %927 = vmatpush3.bf16.msra.mxu1 %v976_v25 }
  0x4c   : > { %895 = vmatprep.subr.bf16.mxu0 %v977_v26  ;;  %920 = vmatprep.subr.bf16.mxu1 %v977_v26 }
  0x4f   : > { %896 = vmatpush3.bf16.msra.mxu0 %v977_v26  ;;  %928 = vmatpush3.bf16.msra.mxu1 %v977_v26 }
  0x52   : > { %898 = vmatmul.mubr.bf16.vlgmr.msra.gmra.mrb[0].mxu0 %v980_v27  ;;  %906 = vmatmul.mubr.bf16.vlgmr.msra.gmra.mrb[0].mxu1 %v981_v28 }
  0x53   : > { %901 = vmatprep.mubr.bf16.mxu0 %v982_v29  ;;  %909 = vmatprep.mubr.bf16.mxu1 %v983_v30 }
  0x5a   : > { %902 = vmatmul.mubr.bf16.gmra.mrb[4].mxu0 %v984_v31  ;;  %910 = vmatmul.mubr.bf16.gmra.mrb[4].mxu1 %v985_v32 }
 0x125   : > { %v899_v37 = vpop.f32.mrb[0].mxu0  ;;  %v907_v38 = vpop.f32.mrb[0].mxu1 }
 0x126   : > { %v617_v41 = vadd.f32 %v899_v37, %v376_v33  ;;  %v625_v42 = vadd.f32 %v907_v38, %v384_v34  ;;  %v552_v43 = vpop.f32.mrb[1].mxu0  ;;  %v584_v44 = vpop.f32.mrb[1].mxu1 }
 0x127   : > { %v615_v47 = vadd.f32 %v552_v43, %v374_v35  ;;  %v623_v48 = vadd.f32 %v584_v44, %v382_v36  ;;  %v900_v49 = vpop.f32.mrb[2].mxu0  ;;  %v908_v50 = vpop.f32.mrb[2].mxu1 }
 0x128   : > { %633 = vst [vmem:[%s1398_s3 + $0x10] sm:$0xff] %v617_v41  ;;  %641 = vst [vmem:[%s1398_s3 + $0x50] sm:$0xff] %v625_v42  ;;  %v618_v51 = vadd.f32 %v900_v49, %v377_v39  ;;  %v626_v52 = vadd.f32 %v908_v50, %v385_v40  ;;  %v555_v53 = vpop.f32.mrb[3].mxu0  ;;  %v587_v54 = vpop.f32.mrb[3].mxu1 }
 0x129   : > { %631 = vst [vmem:[%s1398_s3] sm:$0xff] %v615_v47  ;;  %639 = vst [vmem:[%s1398_s3 + $0x40] sm:$0xff] %v623_v48  ;;  %v616_v55 = vadd.f32 %v555_v53, %v375_v45  ;;  %v624_v56 = vadd.f32 %v587_v54, %v383_v46 }
 0x12a   : > { %634 = vst [vmem:[%s1398_s3 + $0x18] sm:$0xff] %v618_v51  ;;  %642 = vst [vmem:[%s1398_s3 + $0x58] sm:$0xff] %v626_v52 }
 0x12b   : > { %632 = vst [vmem:[%s1398_s3 + $0x8] sm:$0xff] %v616_v55  ;;  %640 = vst [vmem:[%s1398_s3 + $0x48] sm:$0xff] %v624_v56 }
 0x12d   : > { %v903_v61 = vpop.f32.mrb[4].mxu0  ;;  %v911_v62 = vpop.f32.mrb[4].mxu1  ;;  %650 = sbr.rel (%p859_p11) target bundleno = 321 (0x141), region = 81 }
 0x12e   : > { %v621_v1 = vadd.f32 %v903_v61, %v380_v57  ;;  %v629_v2 = vadd.f32 %v911_v62, %v388_v58  ;;  %v568_v3 = vpop.f32.mrb[5].mxu0  ;;  %v600_v4 = vpop.f32.mrb[5].mxu1 }
 0x12f   : > { %v619_v7 = vadd.f32 %v568_v3, %v378_v59  ;;  %v627_v8 = vadd.f32 %v600_v4, %v386_v60  ;;  %v904_v9 = vpop.f32.mrb[6].mxu0  ;;  %v912_v10 = vpop.f32.mrb[6].mxu1  ;;  %v653_v22 = vld [vmem:[%s1398_s3 + $0x10] sm:$0xff] (!%p859_p11) }
 0x130   : > { %637 = vst [vmem:[%s1398_s3 + $0x30] sm:$0xff] %v621_v1  ;;  %645 = vst [vmem:[%s1398_s3 + $0x70] sm:$0xff] %v629_v2  ;;  %v622_v11 = vadd.f32 %v904_v9, %v381_v63  ;;  %v630_v12 = vadd.f32 %v912_v10, %v389_v0  ;;  %v571_v13 = vpop.f32.mrb[7].mxu0  ;;  %v603_v14 = vpop.f32.mrb[7].mxu1  ;;  %v651_v17 = vld [vmem:[%s1398_s3] sm:$0xff] (!%p859_p11)  ;;  %v676_v25 = vadd.f32 (!%p859_p11), %v860_v18, %v653_v22  ;;  %v661_v37 = vld [vmem:[%s1398_s3 + $0x50] sm:$0xff] (!%p859_p11) }
 0x131   : > { %635 = vst [vmem:[%s1398_s3 + $0x20] sm:$0xff] %v619_v7  ;;  %643 = vst [vmem:[%s1398_s3 + $0x60] sm:$0xff] %v627_v8  ;;  %v620_v15 = vadd.f32 %v571_v13, %v379_v5  ;;  %v628_v16 = vadd.f32 %v603_v14, %v387_v6  ;;  %v674_v20 = vadd.f32 (!%p859_p11), %v860_v18, %v651_v17  ;;  %v654_v23 = vld [vmem:[%s1398_s3 + $0x18] sm:$0xff] (!%p859_p11)  ;;  %v659_v35 = vld [vmem:[%s1398_s3 + $0x40] sm:$0xff] (!%p859_p11) }
 0x132   : > { %638 = vst [vmem:[%s1398_s3 + $0x38] sm:$0xff] %v622_v11  ;;  %646 = vst [vmem:[%s1398_s3 + $0x78] sm:$0xff] %v630_v12  ;;  %v652_v19 = vld [vmem:[%s1398_s3 + $0x8] sm:$0xff] (!%p859_p11)  ;;  %v677_v26 = vadd.f32 (!%p859_p11), %v860_v18, %v654_v23  ;;  %v692_v38 = vmax.f32 (!%p859_p11), %v676_v25, 0.0  ;;  %v662_v42 = vld [vmem:[%s1398_s3 + $0x58] sm:$0xff] (!%p859_p11)  ;;  %v682_v47 = vadd.f32 (!%p859_p11), %v860_v18, %v659_v35  ;;  %v684_v52 = vadd.f32 (!%p859_p11), %v860_v18, %v661_v37 }
 0x133   : > { %636 = vst [vmem:[%s1398_s3 + $0x28] sm:$0xff] %v620_v15  ;;  %644 = vst [vmem:[%s1398_s3 + $0x68] sm:$0xff] %v628_v16  ;;  %v675_v21 = vadd.f32 (!%p859_p11), %v860_v18, %v652_v19  ;;  %v690_v31 = vmax.f32 (!%p859_p11), %v674_v20, 0.0  ;;  %v660_v36 = vld [vmem:[%s1398_s3 + $0x48] sm:$0xff] (!%p859_p11)  ;;  %v685_v53 = vadd.f32 (!%p859_p11), %v860_v18, %v662_v42 }
 0x134   : > { %v693_v39 = vmax.f32 %v677_v26, 0.0  ;;  %v683_v48 = vadd.f32 %v860_v18, %v660_v36  ;;  %708 = vst [vmem:[%s1398_s3 + $0x10] sm:$0xff] %v692_v38  ;;  %v698_v55 = vmax.f32 %v682_v47, 0.0  ;;  %v700_v59 = vmax.f32 %v684_v52, 0.0 }
 0x135   : > { %v691_v32 = vmax.f32 %v675_v21, 0.0  ;;  %706 = vst [vmem:[%s1398_s3] sm:$0xff] %v690_v31  ;;  %v701_v60 = vmax.f32 %v685_v53, 0.0 }
 0x136   : > { %709 = vst [vmem:[%s1398_s3 + $0x18] sm:$0xff] %v693_v39  ;;  %v699_v56 = vmax.f32 %v683_v48, 0.0  ;;  %714 = vst [vmem:[%s1398_s3 + $0x40] sm:$0xff] %v698_v55 }
 0x137   : > { %v657_v29 = vld [vmem:[%s1398_s3 + $0x30] sm:$0xff]  ;;  %707 = vst [vmem:[%s1398_s3 + $0x8] sm:$0xff] %v691_v32  ;;  %716 = vst [vmem:[%s1398_s3 + $0x50] sm:$0xff] %v700_v59 }
 0x138   : > { %v655_v24 = vld [vmem:[%s1398_s3 + $0x20] sm:$0xff]  ;;  %v680_v34 = vadd.f32 %v860_v18, %v657_v29  ;;  %v665_v49 = vld [vmem:[%s1398_s3 + $0x70] sm:$0xff]  ;;  %715 = vst [vmem:[%s1398_s3 + $0x48] sm:$0xff] %v699_v56  ;;  %717 = vst [vmem:[%s1398_s3 + $0x58] sm:$0xff] %v701_v60 }
 0x139   : > { %v678_v27 = vadd.f32 %v860_v18, %v655_v24  ;;  %v658_v30 = vld [vmem:[%s1398_s3 + $0x38] sm:$0xff]  ;;  %v663_v43 = vld [vmem:[%s1398_s3 + $0x60] sm:$0xff]  ;;  %v688_v58 = vadd.f32 %v860_v18, %v665_v49 }
 0x13a   : > { %v656_v28 = vld [vmem:[%s1398_s3 + $0x28] sm:$0xff]  ;;  %v681_v41 = vadd.f32 %v860_v18, %v658_v30  ;;  %v696_v46 = vmax.f32 %v680_v34, 0.0  ;;  %v666_v50 = vld [vmem:[%s1398_s3 + $0x78] sm:$0xff]  ;;  %v686_v54 = vadd.f32 %v860_v18, %v663_v43 }
 0x13b   : > { %v679_v33 = vadd.f32 %v860_v18, %v656_v28  ;;  %v694_v40 = vmax.f32 %v678_v27, 0.0  ;;  %v664_v44 = vld [vmem:[%s1398_s3 + $0x68] sm:$0xff]  ;;  %v689_v62 = vadd.f32 %v860_v18, %v666_v50  ;;  %v704_v0 = vmax.f32 %v688_v58, 0.0 }
 0x13c   : > { %v697_v51 = vmax.f32 %v681_v41, 0.0  ;;  %712 = vst [vmem:[%s1398_s3 + $0x30] sm:$0xff] %v696_v46  ;;  %v687_v57 = vadd.f32 %v860_v18, %v664_v44  ;;  %v702_v61 = vmax.f32 %v686_v54, 0.0 }
 0x13d   : > { %v695_v45 = vmax.f32 %v679_v33, 0.0  ;;  %710 = vst [vmem:[%s1398_s3 + $0x20] sm:$0xff] %v694_v40  ;;  %v705_v1 = vmax.f32 %v689_v62, 0.0  ;;  %720 = vst [vmem:[%s1398_s3 + $0x70] sm:$0xff] %v704_v0 }
 0x13e   : > { %713 = vst [vmem:[%s1398_s3 + $0x38] sm:$0xff] %v697_v51  ;;  %v703_v63 = vmax.f32 %v687_v57, 0.0  ;;  %718 = vst [vmem:[%s1398_s3 + $0x60] sm:$0xff] %v702_v61 }
 0x13f   : > { %711 = vst [vmem:[%s1398_s3 + $0x28] sm:$0xff] %v695_v45  ;;  %721 = vst [vmem:[%s1398_s3 + $0x78] sm:$0xff] %v705_v1 }
 0x140   : > { %719 = vst [vmem:[%s1398_s3 + $0x68] sm:$0xff] %v703_v63 }
 0x141 PF: > { %s13_s16 = sadd.s32 1, %s1024_s16   ;;  %s1399_s12 = smov %s1012_s13 }
 0x142   : > { %p10_p12 = scmp.ge.s32.totalorder %s13_s16, 7   ;;  %s1400_s13 = smov %s1082_s20 }
 0x143   : > { %s1401_s14 = smov %s1020_s15  ;;  %s1402_s15 = smov %s1404_s17 }
 0x144   :  { %12 = sbr.rel (!%p10_p12) target bundleno = 3 (0x3), region = 122 }

// kernel: pspnet_forward.12
= control target key start
LH: loop header
LB: loop body
LE: loop exit
PB: predicated region body
PF: predicated region fallthrough
CT: control target
= control target key end

     0   :  { %s1516_s12 = smov 0   ;;  %s1518_s13 = smov 0   ;;  %s1946_s0 = inlined_call_operand.vmem [shape: bf16[128,2304], index: 0, kind: input, shape index: {}]   ;;  %s1947_s1 = inlined_call_operand.vmem [shape: bf16[2304,128], index: 1, kind: input, shape index: {}]   ;;  %s1948_s2 = inlined_call_operand.vmem [shape: f32[1,128], index: 2, kind: input, shape index: {}]   ;;  %s1949_s3 = inlined_call_operand.vmem [shape: f32[128,128], index: 3, kind: output, shape index: {}]  }
   0x1   :  { %s1520_s14 = smov 0   ;;  %s1522_s15 = smov 0  }
   0x2   :  { %s1524_s16 = smov 0  }
   0x3 LB: > { %s25_s17 = sadd.s32 1, %s1489_s15  ;;  %p48_p1 = scmp.ne.s32.totalorder %s1481_s13, %s1477_s12  ;;  %s1493_s16 = sphi %s1524_s16, %s13_s16   ;;  %s1489_s15 = sphi %s1522_s15, %s1953_s15   ;;  %s1485_s14 = sphi %s1520_s14, %s1952_s14   ;;  %s1481_s13 = sphi %s1518_s13, %s1951_s13   ;;  %s1477_s12 = sphi %s1516_s12, %s1950_s12  }
   0x4   : > { %p26_p0 = scmp.ge.s32.totalorder %s25_s17, 6  ;;  %p49_p2 = scmp.eq.s32.totalorder %s1493_s16, 0 }
   0x5   : > { %s41_s19 = sadd.s32 1, %s1481_s13  ;;  %p1152_p5 = scmp.ge.s32.totalorder %s1493_s16, 6 }
   0x6   : > { %s1955_s17 = smov (%p26_p0, %s25_s17), 0  ;;  %p50_p3 = por %p49_p2, %p48_p1 }
   0x7   : > { %s37_s18 = ssub.s32 %s1489_s15, %s1955_s17  ;;  %162 = sbr.rel (%p1152_p5) target bundleno = 37 (0x25), region = 20 }
   0x8   : > { %p39_p4 = scmp.eq.s32.totalorder %s37_s18, 0 }
   0xa   : > { %s1551_s20 = scalar_select %p39_p4, %s1481_s13, %s41_s19  }
   0xe   : > { %165 = sbr.rel (!%p50_p3) target bundleno = 37 (0x25), region = 24  ;;  %s167_s21 = sand.u32 (%p50_p3), 1, %s1481_s13  }
   0xf   : > { %s1243_s22 = smul.u32 (%p50_p3), 12, %s1489_s15 }
  0x10   : > { %s1356_s23 = smul.u32 (%p50_p3), 192, %s167_s21 }
  0x11   : > { %s1559_s26 = scalar_lea.vmem (%p50_p3), %s1946_s0, %s1243_s22 }
  0x12   : > { %v190_v0 = vld [vmem:[%s1559_s26] sm:$0xff] (%p50_p3)  ;;  %v192_v1 = vld [vmem:[%s1559_s26 + $0x48] sm:$0xff] (%p50_p3)  ;;  %v194_v2 = vld [vmem:[%s1559_s26 + $0x90] sm:$0xff] (%p50_p3)  ;;  %s1564_s27 = scalar_lea.vmem (%p50_p3), [#allocation2], %s1356_s23 }
  0x13   : > { %191 = vst [vmem:[%s1564_s27] sm:$0xff] (%p50_p3), %v190_v0  ;;  %193 = vst [vmem:[%s1564_s27 + $0xc] sm:$0xff] (%p50_p3), %v192_v1  ;;  %v196_v3 = vld [vmem:[%s1559_s26 + $0xd8] sm:$0xff] (%p50_p3)  ;;  %v198_v4 = vld [vmem:[%s1559_s26 + $0x120] sm:$0xff] (%p50_p3) }
  0x14   : > { %195 = vst [vmem:[%s1564_s27 + $0x18] sm:$0xff] (%p50_p3), %v194_v2  ;;  %v200_v5 = vld [vmem:[%s1559_s26 + $0x168] sm:$0xff] (%p50_p3)  ;;  %197 = vst [vmem:[%s1564_s27 + $0x24] sm:$0xff] (%p50_p3), %v196_v3  ;;  %v202_v6 = vld [vmem:[%s1559_s26 + $0x1b0] sm:$0xff] (%p50_p3) }
  0x15   : > { %199 = vst [vmem:[%s1564_s27 + $0x30] sm:$0xff] %v198_v4  ;;  %201 = vst [vmem:[%s1564_s27 + $0x3c] sm:$0xff] %v200_v5  ;;  %v204_v7 = vld [vmem:[%s1559_s26 + $0x1f8] sm:$0xff]  ;;  %v206_v8 = vld [vmem:[%s1559_s26 + $0x240] sm:$0xff] }
  0x16   : > { %203 = vst [vmem:[%s1564_s27 + $0x48] sm:$0xff] %v202_v6  ;;  %205 = vst [vmem:[%s1564_s27 + $0x54] sm:$0xff] %v204_v7  ;;  %v208_v9 = vld [vmem:[%s1559_s26 + $0x288] sm:$0xff]  ;;  %v210_v10 = vld [vmem:[%s1559_s26 + $0x2d0] sm:$0xff] }
  0x17   : > { %207 = vst [vmem:[%s1564_s27 + $0x60] sm:$0xff] %v206_v8  ;;  %v212_v11 = vld [vmem:[%s1559_s26 + $0x318] sm:$0xff]  ;;  %209 = vst [vmem:[%s1564_s27 + $0x6c] sm:$0xff] %v208_v9  ;;  %v214_v12 = vld [vmem:[%s1559_s26 + $0x360] sm:$0xff] }
  0x18   : > { %211 = vst [vmem:[%s1564_s27 + $0x78] sm:$0xff] %v210_v10  ;;  %213 = vst [vmem:[%s1564_s27 + $0x84] sm:$0xff] %v212_v11  ;;  %v216_v13 = vld [vmem:[%s1559_s26 + $0x3a8] sm:$0xff]  ;;  %v218_v14 = vld [vmem:[%s1559_s26 + $0x3f0] sm:$0xff] }
  0x19   : > { %215 = vst [vmem:[%s1564_s27 + $0x90] sm:$0xff] %v214_v12  ;;  %217 = vst [vmem:[%s1564_s27 + $0x9c] sm:$0xff] %v216_v13  ;;  %v220_v15 = vld [vmem:[%s1559_s26 + $0x438] sm:$0xff]  ;;  %v1154_v16 = vld [vmem:[%s1559_s26 + $0x8] sm:$0xf] }
  0x1a   : > { %219 = vst [vmem:[%s1564_s27 + $0xa8] sm:$0xff] %v218_v14  ;;  %v1156_v17 = vld [vmem:[%s1559_s26 + $0x50] sm:$0xf]  ;;  %221 = vst [vmem:[%s1564_s27 + $0xb4] sm:$0xff] %v220_v15  ;;  %v1158_v18 = vld [vmem:[%s1559_s26 + $0x98] sm:$0xf] }
  0x1b   : > { %1155 = vst [vmem:[%s1564_s27 + $0x8] sm:$0xf] %v1154_v16  ;;  %1157 = vst [vmem:[%s1564_s27 + $0x14] sm:$0xf] %v1156_v17  ;;  %v1160_v19 = vld [vmem:[%s1559_s26 + $0xe0] sm:$0xf] }
  0x1c   : > { %v1162_v20 = vld [vmem:[%s1559_s26 + $0x128] sm:$0xf]  ;;  %1159 = vst [vmem:[%s1564_s27 + $0x20] sm:$0xf] %v1158_v18  ;;  %1161 = vst [vmem:[%s1564_s27 + $0x2c] sm:$0xf] %v1160_v19 }
  0x1d   : > { %1163 = vst [vmem:[%s1564_s27 + $0x38] sm:$0xf] %v1162_v20  ;;  %v1164_v21 = vld [vmem:[%s1559_s26 + $0x170] sm:$0xf]  ;;  %v1166_v22 = vld [vmem:[%s1559_s26 + $0x1b8] sm:$0xf] }
  0x1e   : > { %v1168_v23 = vld [vmem:[%s1559_s26 + $0x200] sm:$0xf]  ;;  %1165 = vst [vmem:[%s1564_s27 + $0x44] sm:$0xf] %v1164_v21  ;;  %1167 = vst [vmem:[%s1564_s27 + $0x50] sm:$0xf] %v1166_v22 }
  0x1f   : > { %1169 = vst [vmem:[%s1564_s27 + $0x5c] sm:$0xf] %v1168_v23  ;;  %v1170_v24 = vld [vmem:[%s1559_s26 + $0x248] sm:$0xf]  ;;  %v1172_v25 = vld [vmem:[%s1559_s26 + $0x290] sm:$0xf] }
  0x20   : > { %v1174_v26 = vld [vmem:[%s1559_s26 + $0x2d8] sm:$0xf]  ;;  %1171 = vst [vmem:[%s1564_s27 + $0x68] sm:$0xf] %v1170_v24  ;;  %1173 = vst [vmem:[%s1564_s27 + $0x74] sm:$0xf] %v1172_v25 }
  0x21   : > { %1175 = vst [vmem:[%s1564_s27 + $0x80] sm:$0xf] %v1174_v26  ;;  %v1176_v27 = vld [vmem:[%s1559_s26 + $0x320] sm:$0xf]  ;;  %v1178_v28 = vld [vmem:[%s1559_s26 + $0x368] sm:$0xf] }
  0x22   : > { %v1180_v29 = vld [vmem:[%s1559_s26 + $0x3b0] sm:$0xf]  ;;  %1177 = vst [vmem:[%s1564_s27 + $0x8c] sm:$0xf] %v1176_v27  ;;  %1179 = vst [vmem:[%s1564_s27 + $0x98] sm:$0xf] %v1178_v28 }
  0x23   : > { %1181 = vst [vmem:[%s1564_s27 + $0xa4] sm:$0xf] %v1180_v29  ;;  %v1182_v30 = vld [vmem:[%s1559_s26 + $0x3f8] sm:$0xf]  ;;  %v1184_v31 = vld [vmem:[%s1559_s26 + $0x440] sm:$0xf] }
  0x24   : > { %1183 = vst [vmem:[%s1564_s27 + $0xb0] sm:$0xf] %v1182_v30  ;;  %1185 = vst [vmem:[%s1564_s27 + $0xbc] sm:$0xf] %v1184_v31 }
  0x25 PF: > { %p1186_p6 = scmp.ge.s32.totalorder %s1493_s16, 1  ;;  %p277_p7 = scmp.lt.s32.totalorder %s1493_s16, 7 }
  0x27   : > { %p278_p8 = pnand %p1186_p6, %p277_p7 }
  0x28   : > { %s284_s28 = sand.u32 (!%p278_p8), 1, %s1477_s12   ;;  %s323_s29 = smul.u32 (!%p278_p8), 48, %s1485_s14 }
  0x29   : > { %281 = sbr.rel (%p278_p8) target bundleno = 381 (0x17d), region = 54  ;;  %p1188_p10 = scmp.ne.s32.totalorder (!%p278_p8), %s1485_s14, 0 }
  0x2a   : > { %s1357_s30 = smul.u32 (!%p278_p8), 192, %s284_s28  ;;  %p324_p9 = scmp.lt.s32.totalorder (!%p278_p8), %s323_s29, 287 }
  0x2c   : > { %s1636_s8 = scalar_lea.vmem (!%p278_p8), [#allocation2], %s1357_s30 }
  0x30   : > { %s1957_s29 = smov (!%p324_p9, %s323_s29), 287  ;;  %348 = sbr.rel (%p1188_p10) target bundleno = 58 (0x3a), region = 62 }
  0x31   : > { %s1187_s4 = sshll.u32 %s1957_s29, 2  ;;  %v1495_v32 = vmov (!%p1188_p10), 0.0  }
  0x32   : > { %s1634_s7 = scalar_lea.vmem %s1947_s1, %s1187_s4  ;;  %349 = vst [vmem:[%s1949_s3] sm:$0xff] (!%p1188_p10), %v1495_v32  ;;  %350 = vst [vmem:[%s1949_s3 + $0x8] sm:$0xff] (!%p1188_p10), %v1495_v32 }
  0x33   : > { %351 = vst [vmem:[%s1949_s3 + $0x10] sm:$0xff] (!%p1188_p10), %v1495_v32  ;;  %352 = vst [vmem:[%s1949_s3 + $0x18] sm:$0xff] (!%p1188_p10), %v1495_v32 }
  0x34   : > { %353 = vst [vmem:[%s1949_s3 + $0x20] sm:$0xff] (!%p1188_p10), %v1495_v32  ;;  %354 = vst [vmem:[%s1949_s3 + $0x28] sm:$0xff] (!%p1188_p10), %v1495_v32 }
  0x35   : > { %355 = vst [vmem:[%s1949_s3 + $0x30] sm:$0xff] (!%p1188_p10), %v1495_v32  ;;  %356 = vst [vmem:[%s1949_s3 + $0x38] sm:$0xff] (!%p1188_p10), %v1495_v32 }
  0x36   : > { %357 = vst [vmem:[%s1949_s3 + $0x40] sm:$0xff] (!%p1188_p10), %v1495_v32  ;;  %358 = vst [vmem:[%s1949_s3 + $0x48] sm:$0xff] (!%p1188_p10), %v1495_v32 }
  0x37   : > { %359 = vst [vmem:[%s1949_s3 + $0x50] sm:$0xff] %v1495_v32  ;;  %360 = vst [vmem:[%s1949_s3 + $0x58] sm:$0xff] %v1495_v32 }
  0x38   : > { %361 = vst [vmem:[%s1949_s3 + $0x60] sm:$0xff] %v1495_v32  ;;  %362 = vst [vmem:[%s1949_s3 + $0x68] sm:$0xff] %v1495_v32 }
  0x39   : > { %363 = vst [vmem:[%s1949_s3 + $0x70] sm:$0xff] %v1495_v32  ;;  %364 = vst [vmem:[%s1949_s3 + $0x78] sm:$0xff] %v1495_v32 }
  0x3a PF: > { %v1399_v33 = vld [vmem:[%s1634_s7 + $0x40] sm:$0xff]   ;;  %v1402_v36 = vld [vmem:[%s1634_s7 + $0x48] sm:$0xff]   ;;  %v1405_v39 = vld [vmem:[%s1634_s7 + $0x50] sm:$0xff]   ;;  %p1237_p11 = scmp.ne.s32.totalorder %s1485_s14, 5 }
  0x3b   : > { %v1400_v34 = vld [vmem:[%s1634_s7] sm:$0xff]   ;;  %1244 = vmatprep.subr.bf16.mxu0 %v1399_v33  ;;  %v1403_v37 = vld [vmem:[%s1634_s7 + $0x8] sm:$0xff]   ;;  %v1406_v40 = vld [vmem:[%s1634_s7 + $0x10] sm:$0xff]  }
  0x3c   : > { %v1401_v35 = vld [vmem:[%s1634_s7 + $0x80] sm:$0xff]   ;;  %1245 = vmatpush3.bf16.msra.mxu0 %v1400_v34  ;;  %v1404_v38 = vld [vmem:[%s1634_s7 + $0x88] sm:$0xff]   ;;  %v1407_v41 = vld [vmem:[%s1634_s7 + $0x90] sm:$0xff]  }
  0x3d   : > { %1324 = vmatprep.subr.bf16.mxu1 %v1401_v35  ;;  %1246 = vmatprep.subr.bf16.mxu0 %v1402_v36  ;;  %v1408_v42 = vld [vmem:[%s1634_s7 + $0x58] sm:$0xff]   ;;  %v1411_v45 = vld [vmem:[%s1634_s7 + $0x60] sm:$0xff]   ;;  %v1414_v48 = vld [vmem:[%s1634_s7 + $0x68] sm:$0xff]  }
  0x3e   : > { %1325 = vmatpush3.bf16.msra.mxu1 %v1401_v35  ;;  %v1409_v43 = vld [vmem:[%s1634_s7 + $0x18] sm:$0xff]   ;;  %v1413_v46 = vld [vmem:[%s1634_s7 + $0xa0] sm:$0xff]   ;;  %v1416_v49 = vld [vmem:[%s1634_s7 + $0xa8] sm:$0xff]  }
  0x3f   : > { %1326 = vmatprep.subr.bf16.mxu1 %v1404_v38  ;;  %v1410_v44 = vld [vmem:[%s1634_s7 + $0x98] sm:$0xff]   ;;  %v1412_v47 = vld [vmem:[%s1634_s7 + $0x20] sm:$0xff]   ;;  %v1415_v50 = vld [vmem:[%s1634_s7 + $0x28] sm:$0xff]  }
  0x40   : > { %1247 = vmatpush3.bf16.msra.mxu0 %v1403_v37  ;;  %v1417_v51 = vld [vmem:[%s1634_s7 + $0x70] sm:$0xff]   ;;  %v1420_v54 = vld [vmem:[%s1634_s7 + $0x78] sm:$0xff]   ;;  %v1423_v59 = vld [vmem:[%s1636_s8] ss:$12 sps:$4 sm:$0xff]  }
  0x41   : > { %1248 = vmatprep.subr.bf16.mxu0 %v1405_v39  ;;  %v1418_v52 = vld [vmem:[%s1634_s7 + $0x30] sm:$0xff]   ;;  %v1422_v55 = vld [vmem:[%s1634_s7 + $0xb8] sm:$0xff]   ;;  %v1427_v61 = vld [vmem:[%s1636_s8 + $0x20] ss:$12 sps:$4 sm:$0xff]  }
  0x42   : > { %1327 = vmatpush3.bf16.msra.mxu1 %v1404_v38  ;;  %v1419_v53 = vld [vmem:[%s1634_s7 + $0xb0] sm:$0xff]   ;;  %v1421_v58 = vld [vmem:[%s1634_s7 + $0x38] sm:$0xff]   ;;  %v1443_v5 = vld [vmem:[%s1636_s8 + $0x80] ss:$12 sps:$4 sm:$0xff]  }
  0x43   : > { %1328 = vmatprep.subr.bf16.mxu1 %v1407_v41  ;;  %v1425_v56 = vld [vmem:[%s1636_s8 + $0x4] ss:$12 sps:$4 sm:$0xff]   ;;  %v1426_v57 = vld [vmem:[%s1636_s8 + $0x8] ss:$12 sps:$4 sm:$0xff]   ;;  %v1436_v4 = vld [vmem:[%s1636_s8 + $0x4c] ss:$12 sps:$4 sm:$0xff]  }
  0x44   : > { %1249 = vmatpush3.bf16.msra.mxu0 %v1406_v40  ;;  %765 = vmatprep.mubr.bf16.mxu0 %v1425_v56  ;;  %v1428_v60 = vld [vmem:[%s1636_s8 + $0x1c] ss:$12 sps:$4 sm:$0xff]   ;;  %v1434_v62 = vld [vmem:[%s1636_s8 + $0x38] ss:$12 sps:$4 sm:$0xff]   ;;  %v1431_v0 = vld [vmem:[%s1636_s8 + $0x34] ss:$12 sps:$4 sm:$0xff]  }
  0x45   : > { %1250 = vmatprep.subr.bf16.mxu0 %v1408_v42  ;;  %1340 = vmatprep.mubr.bf16.mxu1 %v1426_v57  ;;  %v1430_v63 = vld [vmem:[%s1636_s8 + $0x18] ss:$12 sps:$4 sm:$0xff]   ;;  %v1435_v1 = vld [vmem:[%s1636_s8 + $0x50] ss:$12 sps:$4 sm:$0xff]   ;;  %v1442_v2 = vld [vmem:[%s1636_s8 + $0x68] ss:$12 sps:$4 sm:$0xff]  }
  0x46   : > { %1329 = vmatpush3.bf16.msra.mxu1 %v1407_v41  ;;  %v1433_v3 = vld [vmem:[%s1636_s8 + $0x30] ss:$12 sps:$4 sm:$0xff]   ;;  %v1450_v6 = vld [vmem:[%s1636_s8 + $0x98] ss:$12 sps:$4 sm:$0xff]   ;;  %v1438_v7 = vld [vmem:[%s1636_s8 + $0x48] ss:$12 sps:$4 sm:$0xff]  }
  0x47   : > { %1330 = vmatprep.subr.bf16.mxu1 %v1410_v44  ;;  %v1439_v8 = vld [vmem:[%s1636_s8 + $0x64] ss:$12 sps:$4 sm:$0xff]   ;;  %v1441_v10 = vld [vmem:[%s1636_s8 + $0x60] ss:$12 sps:$4 sm:$0xff]   ;;  %v1444_v11 = vld [vmem:[%s1636_s8 + $0x7c] ss:$12 sps:$4 sm:$0xff]  }
  0x48   : > { %1251 = vmatpush3.bf16.msra.mxu0 %v1409_v43  ;;  %v1451_v9 = vld [vmem:[%s1636_s8 + $0xb0] ss:$12 sps:$4 sm:$0xff]   ;;  %v1446_v12 = vld [vmem:[%s1636_s8 + $0x78] ss:$12 sps:$4 sm:$0xff]   ;;  %v1447_v13 = vld [vmem:[%s1636_s8 + $0x94] ss:$12 sps:$4 sm:$0xff]  }
  0x49   : > { %1252 = vmatprep.subr.bf16.mxu0 %v1411_v45  ;;  %v1449_v14 = vld [vmem:[%s1636_s8 + $0x90] ss:$12 sps:$4 sm:$0xff]   ;;  %v1452_v15 = vld [vmem:[%s1636_s8 + $0xac] ss:$12 sps:$4 sm:$0xff]   ;;  %v1454_v16 = vld [vmem:[%s1636_s8 + $0xa8] ss:$12 sps:$4 sm:$0xff]  }
  0x4a   : > { %1331 = vmatpush3.bf16.msra.mxu1 %v1410_v44  ;;  %v365_v23 = vld [vmem:[%s1949_s3] sm:$0xff]  ;;  %v366_v28 = vld [vmem:[%s1949_s3 + $0x8] sm:$0xff]  ;;  %v367_v38 = vld [vmem:[%s1949_s3 + $0x10] sm:$0xff] }
  0x4b   : > { %1332 = vmatprep.subr.bf16.mxu1 %v1413_v46  ;;  %v368_v44 = vld [vmem:[%s1949_s3 + $0x18] sm:$0xff] }
  0x4c   : > { %1253 = vmatpush3.bf16.msra.mxu0 %v1412_v47 }
  0x4d   : > { %1254 = vmatprep.subr.bf16.mxu0 %v1414_v48 }
  0x4e   : > { %1333 = vmatpush3.bf16.msra.mxu1 %v1413_v46 }
  0x4f   : > { %1334 = vmatprep.subr.bf16.mxu1 %v1416_v49 }
  0x50   : > { %1255 = vmatpush3.bf16.msra.mxu0 %v1415_v50 }
  0x51   : > { %1256 = vmatprep.subr.bf16.mxu0 %v1417_v51 }
  0x52   : > { %1335 = vmatpush3.bf16.msra.mxu1 %v1416_v49 }
  0x53   : > { %1336 = vmatprep.subr.bf16.mxu1 %v1419_v53 }
  0x54   : > { %1257 = vmatpush3.bf16.msra.mxu0 %v1418_v52 }
  0x55   : > { %1258 = vmatprep.subr.bf16.mxu0 %v1420_v54 }
  0x56   : > { %1337 = vmatpush3.bf16.msra.mxu1 %v1419_v53 }
  0x57   : > { %1338 = vmatprep.subr.bf16.mxu1 %v1422_v55 }
  0x58   : > { %1259 = vmatpush3.bf16.msra.mxu0 %v1421_v58 }
  0x5a   : > { %1339 = vmatpush3.bf16.msra.mxu1 %v1422_v55  ;;  %v369_v55 = vld [vmem:[%s1949_s3 + $0x20] sm:$0xff] }
  0x5b   : > { %766 = vmatmul.mubr.bf16.vlgmr.msra.gmra.mrb[0].mxu0 %v1423_v59 }
  0x5c   : > { %773 = vmatprep.mubr.bf16.mxu0 %v1428_v60  ;;  %v370_v60 = vld [vmem:[%s1949_s3 + $0x28] sm:$0xff] }
  0x5d   : > { %1341 = vmatmul.mubr.bf16.vlgmr.msra.gmra.mrb[0].mxu1 %v1427_v61 }
  0x5e   : > { %1344 = vmatprep.mubr.bf16.mxu1 %v1434_v62 }
  0x63   : > { %774 = vmatmul.mubr.bf16.gmra.mrb[4].mxu0 %v1430_v63 }
  0x64   : > { %781 = vmatprep.mubr.bf16.mxu0 %v1431_v0 }
  0x65   : > { %1345 = vmatmul.mubr.bf16.gmra.mrb[4].mxu1 %v1435_v1 }
  0x66   : > { %1348 = vmatprep.mubr.bf16.mxu1 %v1442_v2 }
  0x6b   : > { %782 = vmatmul.mubr.bf16.gmra.mrb[8].mxu0 %v1433_v3 }
  0x6c   : > { %789 = vmatprep.mubr.bf16.mxu0 %v1436_v4 }
  0x6d   : > { %1349 = vmatmul.mubr.bf16.gmra.mrb[8].mxu1 %v1443_v5 }
  0x6e   : > { %1352 = vmatprep.mubr.bf16.mxu1 %v1450_v6  ;;  %v371_v6 = vld [vmem:[%s1949_s3 + $0x30] sm:$0xff] }
  0x73   : > { %790 = vmatmul.mubr.bf16.gmra.mrb[12].mxu0 %v1438_v7 }
  0x74   : > { %797 = vmatprep.mubr.bf16.mxu0 %v1439_v8 }
  0x75   : > { %1353 = vmatmul.mubr.bf16.gmra.mrb[12].mxu1 %v1451_v9 }
  0x7b   : > { %798 = vmatmul.mubr.bf16.gmra.mrb[16].mxu0 %v1441_v10 }
  0x7c   : > { %805 = vmatprep.mubr.bf16.mxu0 %v1444_v11 }
  0x83   : > { %806 = vmatmul.mubr.bf16.gmra.mrb[20].mxu0 %v1446_v12  ;;  %v372_v12 = vld [vmem:[%s1949_s3 + $0x38] sm:$0xff] }
  0x84   : > { %813 = vmatprep.mubr.bf16.mxu0 %v1447_v13 }
  0x8b   : > { %814 = vmatmul.mubr.bf16.gmra.mrb[24].mxu0 %v1449_v14 }
  0x8c   : > { %821 = vmatprep.mubr.bf16.mxu0 %v1452_v15 }
  0x93   : > { %822 = vmatmul.mubr.bf16.gmra.mrb[28].mxu0 %v1454_v16 }
 0x12e   : > { %v1260_v17 = vpop.f32.mrb[0].mxu0 }
 0x12f   : > { %v1261_v18 = vpop.f32.mrb[1].mxu0 }
 0x130   : > { %v1262_v19 = vadd.f32 %v1261_v18, %v1260_v17  ;;  %v1263_v20 = vpop.f32.mrb[2].mxu0  ;;  %v1342_v21 = vpop.f32.mrb[0].mxu1 }
 0x131   : > { %v1264_v22 = vpop.f32.mrb[3].mxu0  ;;  %v864_v24 = vpop.f32.mrb[1].mxu1 }
 0x132   : > { %v1265_v25 = vadd.f32 %v1264_v22, %v1263_v20  ;;  %v865_v26 = vadd.f32 %v1262_v19, %v864_v24  ;;  %v1343_v27 = vpop.f32.mrb[2].mxu1  ;;  %v373_v22 = vld [vmem:[%s1949_s3 + $0x40] sm:$0xff] }
 0x133   : > { %v867_v29 = vpop.f32.mrb[3].mxu1 }
 0x134   : > { %v927_v30 = vadd.f32 %v865_v26, %v365_v23  ;;  %v868_v31 = vadd.f32 %v1265_v25, %v867_v29  ;;  %v374_v25 = vld [vmem:[%s1949_s3 + $0x48] sm:$0xff] }
 0x136   : > { %943 = vst [vmem:[%s1949_s3] sm:$0xff] %v927_v30  ;;  %v928_v32 = vadd.f32 %v868_v31, %v366_v28  ;;  %v1266_v33 = vpop.f32.mrb[4].mxu0 }
 0x137   : > { %v1267_v34 = vpop.f32.mrb[5].mxu0 }
 0x138   : > { %944 = vst [vmem:[%s1949_s3 + $0x8] sm:$0xff] %v928_v32  ;;  %v1268_v35 = vadd.f32 %v1267_v34, %v1266_v33  ;;  %v1269_v36 = vpop.f32.mrb[6].mxu0  ;;  %v1346_v37 = vpop.f32.mrb[4].mxu1  ;;  %v375_v33 = vld [vmem:[%s1949_s3 + $0x50] sm:$0xff] }
 0x139   : > { %v1270_v39 = vpop.f32.mrb[7].mxu0  ;;  %v880_v40 = vpop.f32.mrb[5].mxu1 }
 0x13a   : > { %v873_v41 = vadd.f32 %v1342_v21, %v1268_v35  ;;  %v1271_v42 = vadd.f32 %v1270_v39, %v1269_v36  ;;  %v1347_v43 = vpop.f32.mrb[6].mxu1 }
 0x13b   : > { %v883_v45 = vpop.f32.mrb[7].mxu1 }
 0x13c   : > { %v929_v46 = vadd.f32 %v873_v41, %v367_v38  ;;  %v876_v47 = vadd.f32 %v1343_v27, %v1271_v42 }
 0x13e   : > { %945 = vst [vmem:[%s1949_s3 + $0x10] sm:$0xff] %v929_v46  ;;  %v930_v48 = vadd.f32 %v876_v47, %v368_v44  ;;  %v1272_v49 = vpop.f32.mrb[8].mxu0  ;;  %v377_v46 = vld [vmem:[%s1949_s3 + $0x60] sm:$0xff] }
 0x13f   : > { %v1273_v50 = vpop.f32.mrb[9].mxu0 }
 0x140   : > { %946 = vst [vmem:[%s1949_s3 + $0x18] sm:$0xff] %v930_v48  ;;  %v1274_v51 = vadd.f32 %v1273_v50, %v1272_v49  ;;  %v1275_v52 = vpop.f32.mrb[10].mxu0  ;;  %v1350_v53 = vpop.f32.mrb[8].mxu1  ;;  %v378_v49 = vld [vmem:[%s1949_s3 + $0x68] sm:$0xff] }
 0x141   : > { %v1276_v54 = vpop.f32.mrb[11].mxu0  ;;  %v896_v56 = vpop.f32.mrb[9].mxu1 }
 0x142   : > { %v1277_v57 = vadd.f32 %v1276_v54, %v1275_v52  ;;  %v881_v58 = vadd.f32 %v1274_v51, %v880_v40  ;;  %v1351_v59 = vpop.f32.mrb[10].mxu1 }
 0x143   : > { %v899_v61 = vpop.f32.mrb[11].mxu1 }
 0x144   : > { %v931_v62 = vadd.f32 %v881_v58, %v369_v55  ;;  %v884_v63 = vadd.f32 %v1277_v57, %v883_v45  ;;  %v379_v57 = vld [vmem:[%s1949_s3 + $0x70] sm:$0xff] }
 0x146   : > { %947 = vst [vmem:[%s1949_s3 + $0x20] sm:$0xff] %v931_v62  ;;  %v932_v0 = vadd.f32 %v884_v63, %v370_v60  ;;  %v1278_v1 = vpop.f32.mrb[12].mxu0 }
 0x147   : > { %v1279_v2 = vpop.f32.mrb[13].mxu0 }
 0x148   : > { %948 = vst [vmem:[%s1949_s3 + $0x28] sm:$0xff] %v932_v0  ;;  %v1280_v3 = vadd.f32 %v1279_v2, %v1278_v1  ;;  %v1281_v4 = vpop.f32.mrb[14].mxu0  ;;  %v1354_v5 = vpop.f32.mrb[12].mxu1  ;;  %v963_v1 = vld [vmem:[%s1949_s3] sm:$0xff] (!%p1237_p11) }
 0x149   : > { %v1282_v7 = vpop.f32.mrb[15].mxu0  ;;  %v912_v8 = vpop.f32.mrb[13].mxu1  ;;  %v1238_v2 = vld [vmem:[%s1948_s2] ss:$0 sm:$0xff] (!%p1237_p11) }
 0x14a   : > { %v889_v9 = vadd.f32 %v1346_v37, %v1280_v3  ;;  %v1283_v10 = vadd.f32 %v1282_v7, %v1281_v4  ;;  %v1355_v11 = vpop.f32.mrb[14].mxu1  ;;  %v376_v37 = vld [vmem:[%s1949_s3 + $0x58] sm:$0xff]  ;;  %v964_v3 = vld [vmem:[%s1949_s3 + $0x8] sm:$0xff] (!%p1237_p11)  ;;  %v986_v4 = vadd.f32 (!%p1237_p11), %v1238_v2, %v963_v1 }
 0x14b   : > { %v915_v13 = vpop.f32.mrb[15].mxu1  ;;  %v966_v7 = vld [vmem:[%s1949_s3 + $0x18] sm:$0xff] (!%p1237_p11) }
 0x14c   : > { %v933_v14 = vadd.f32 %v889_v9, %v371_v6  ;;  %v892_v15 = vadd.f32 %v1347_v43, %v1283_v10  ;;  %v965_v6 = vld [vmem:[%s1949_s3 + $0x10] sm:$0xff] (!%p1237_p11)  ;;  %v989_v10 = vadd.f32 (!%p1237_p11), %v1238_v2, %v966_v7 }
 0x14d   : > { %v988_v9 = vadd.f32 (!%p1237_p11), %v1238_v2, %v965_v6 }
 0x14e   : > { %949 = vst [vmem:[%s1949_s3 + $0x30] sm:$0xff] %v933_v14  ;;  %v934_v16 = vadd.f32 %v892_v15, %v372_v12  ;;  %v1284_v17 = vpop.f32.mrb[16].mxu0  ;;  %v1002_v15 = vmax.f32 (!%p1237_p11), %v986_v4, 0.0 }
 0x14f   : > { %v1285_v18 = vpop.f32.mrb[17].mxu0  ;;  %v968_v12 = vld [vmem:[%s1949_s3 + $0x28] sm:$0xff] (!%p1237_p11) }
 0x150   : > { %950 = vst [vmem:[%s1949_s3 + $0x38] sm:$0xff] %v934_v16  ;;  %v1286_v19 = vadd.f32 %v1285_v18, %v1284_v17  ;;  %v1287_v20 = vpop.f32.mrb[18].mxu0  ;;  %v991_v17 = vadd.f32 (!%p1237_p11), %v1238_v2, %v968_v12  ;;  %1018 = vst [vmem:[%s1949_s3] sm:$0xff] (!%p1237_p11), %v1002_v15 }
 0x151   : > { %v1288_v21 = vpop.f32.mrb[19].mxu0 }
 0x152   : > { %v1289_v23 = vadd.f32 %v1288_v21, %v1287_v20  ;;  %v897_v24 = vadd.f32 %v1286_v19, %v896_v56 }
 0x154   : > { %v935_v26 = vadd.f32 %v897_v24, %v373_v22  ;;  %v900_v27 = vadd.f32 %v1289_v23, %v899_v61  ;;  %v380_v61 = vld [vmem:[%s1949_s3 + $0x78] sm:$0xff]  ;;  %v1004_v22 = vmax.f32 (!%p1237_p11), %v988_v9, 0.0  ;;  %v1005_v23 = vmax.f32 (!%p1237_p11), %v989_v10, 0.0 }
 0x156   : > { %951 = vst [vmem:[%s1949_s3 + $0x40] sm:$0xff] %v935_v26  ;;  %v936_v28 = vadd.f32 %v900_v27, %v374_v25  ;;  %v1290_v29 = vpop.f32.mrb[20].mxu0  ;;  %1020 = vst [vmem:[%s1949_s3 + $0x10] sm:$0xff] (!%p1237_p11), %v1004_v22 }
 0x157   : > { %v1291_v30 = vpop.f32.mrb[21].mxu0  ;;  %v970_v14 = vld [vmem:[%s1949_s3 + $0x38] sm:$0xff] (!%p1237_p11)  ;;  %1021 = vst [vmem:[%s1949_s3 + $0x18] sm:$0xff] (!%p1237_p11), %v1005_v23 }
 0x158   : > { %952 = vst [vmem:[%s1949_s3 + $0x48] sm:$0xff] %v936_v28  ;;  %v1292_v31 = vadd.f32 %v1291_v30, %v1290_v29  ;;  %v1293_v32 = vpop.f32.mrb[22].mxu0  ;;  %v993_v25 = vadd.f32 (!%p1237_p11), %v1238_v2, %v970_v14  ;;  %v1007_v29 = vmax.f32 (!%p1237_p11), %v991_v17, 0.0 }
 0x159   : > { %v1294_v34 = vpop.f32.mrb[23].mxu0 }
 0x15a   : > { %v905_v35 = vadd.f32 %v1350_v53, %v1292_v31  ;;  %v1295_v36 = vadd.f32 %v1294_v34, %v1293_v32  ;;  %1023 = vst [vmem:[%s1949_s3 + $0x28] sm:$0xff] (!%p1237_p11), %v1007_v29 }
 0x15c   : > { %v937_v38 = vadd.f32 %v905_v35, %v375_v33  ;;  %v908_v39 = vadd.f32 %v1351_v59, %v1295_v36  ;;  %v1009_v35 = vmax.f32 (!%p1237_p11), %v993_v25, 0.0 }
 0x15d   : > { %v971_v19 = vld [vmem:[%s1949_s3 + $0x40] sm:$0xff] (!%p1237_p11) }
 0x15e   : > { %953 = vst [vmem:[%s1949_s3 + $0x50] sm:$0xff] %v937_v38  ;;  %v938_v40 = vadd.f32 %v908_v39, %v376_v37  ;;  %v1296_v41 = vpop.f32.mrb[24].mxu0  ;;  %v994_v31 = vadd.f32 (!%p1237_p11), %v1238_v2, %v971_v19  ;;  %1025 = vst [vmem:[%s1949_s3 + $0x38] sm:$0xff] (!%p1237_p11), %v1009_v35 }
 0x15f   : > { %v1297_v42 = vpop.f32.mrb[25].mxu0  ;;  %v972_v20 = vld [vmem:[%s1949_s3 + $0x48] sm:$0xff] (!%p1237_p11) }
 0x160   : > { %954 = vst [vmem:[%s1949_s3 + $0x58] sm:$0xff] %v938_v40  ;;  %v1298_v43 = vadd.f32 %v1297_v42, %v1296_v41  ;;  %v1299_v44 = vpop.f32.mrb[26].mxu0  ;;  %v995_v32 = vadd.f32 (!%p1237_p11), %v1238_v2, %v972_v20  ;;  %v1010_v39 = vmax.f32 (!%p1237_p11), %v994_v31, 0.0 }
 0x161   : > { %v1300_v45 = vpop.f32.mrb[27].mxu0 }
 0x162   : > { %v1301_v47 = vadd.f32 %v1300_v45, %v1299_v44  ;;  %v913_v48 = vadd.f32 %v1298_v43, %v912_v8  ;;  %v967_v8 = vld [vmem:[%s1949_s3 + $0x20] sm:$0xff] (!%p1237_p11)  ;;  %v1011_v40 = vmax.f32 (!%p1237_p11), %v995_v32, 0.0  ;;  %1026 = vst [vmem:[%s1949_s3 + $0x40] sm:$0xff] (!%p1237_p11), %v1010_v39 }
 0x164   : > { %v939_v50 = vadd.f32 %v913_v48, %v377_v46  ;;  %v916_v51 = vadd.f32 %v1301_v47, %v915_v13  ;;  %v969_v13 = vld [vmem:[%s1949_s3 + $0x30] sm:$0xff] (!%p1237_p11)  ;;  %1027 = vst [vmem:[%s1949_s3 + $0x48] sm:$0xff] (!%p1237_p11), %v1011_v40 }
 0x165   : > { %v992_v18 = vadd.f32 (!%p1237_p11), %v1238_v2, %v969_v13  ;;  %v973_v21 = vld [vmem:[%s1949_s3 + $0x50] sm:$0xff] (!%p1237_p11) }
 0x166   : > { %955 = vst [vmem:[%s1949_s3 + $0x60] sm:$0xff] %v939_v50  ;;  %v940_v52 = vadd.f32 %v916_v51, %v378_v49  ;;  %v1302_v53 = vpop.f32.mrb[28].mxu0  ;;  %v996_v36 = vadd.f32 (!%p1237_p11), %v1238_v2, %v973_v21 }
 0x167   : > { %v1303_v54 = vpop.f32.mrb[29].mxu0  ;;  %v974_v26 = vld [vmem:[%s1949_s3 + $0x58] sm:$0xff] (!%p1237_p11)  ;;  %v1008_v30 = vmax.f32 (!%p1237_p11), %v992_v18, 0.0 }
 0x168   : > { %956 = vst [vmem:[%s1949_s3 + $0x68] sm:$0xff] %v940_v52  ;;  %v1304_v55 = vadd.f32 %v1303_v54, %v1302_v53  ;;  %v1305_v56 = vpop.f32.mrb[30].mxu0  ;;  %v997_v37 = vadd.f32 (!%p1237_p11), %v1238_v2, %v974_v26  ;;  %v1012_v43 = vmax.f32 (!%p1237_p11), %v996_v36, 0.0 }
 0x169   : > { %v1306_v58 = vpop.f32.mrb[31].mxu0  ;;  %1024 = vst [vmem:[%s1949_s3 + $0x30] sm:$0xff] (!%p1237_p11), %v1008_v30 }
 0x16a   : > { %v921_v59 = vadd.f32 %v1354_v5, %v1304_v55  ;;  %v1307_v60 = vadd.f32 %v1306_v58, %v1305_v56  ;;  %962 = sbr.rel (%p1237_p11) target bundleno = 381 (0x17d), region = 66  ;;  %v987_v5 = vadd.f32 (!%p1237_p11), %v1238_v2, %v964_v3  ;;  %v1013_v44 = vmax.f32 (!%p1237_p11), %v997_v37, 0.0  ;;  %1028 = vst [vmem:[%s1949_s3 + $0x50] sm:$0xff] (!%p1237_p11), %v1012_v43 }
 0x16c   : > { %v941_v62 = vadd.f32 %v921_v59, %v379_v57  ;;  %v924_v63 = vadd.f32 %v1355_v11, %v1307_v60  ;;  %v990_v11 = vadd.f32 (!%p1237_p11), %v1238_v2, %v967_v8  ;;  %v1003_v16 = vmax.f32 (!%p1237_p11), %v987_v5, 0.0  ;;  %1029 = vst [vmem:[%s1949_s3 + $0x58] sm:$0xff] (!%p1237_p11), %v1013_v44 }
 0x16d   : > { %v975_v27 = vld [vmem:[%s1949_s3 + $0x60] sm:$0xff] (!%p1237_p11) }
 0x16e   : > { %957 = vst [vmem:[%s1949_s3 + $0x70] sm:$0xff] %v941_v62  ;;  %v942_v0 = vadd.f32 %v924_v63, %v380_v61  ;;  %v1006_v24 = vmax.f32 (!%p1237_p11), %v990_v11, 0.0  ;;  %1019 = vst [vmem:[%s1949_s3 + $0x8] sm:$0xff] (!%p1237_p11), %v1003_v16  ;;  %v998_v38 = vadd.f32 (!%p1237_p11), %v1238_v2, %v975_v27 }
 0x16f   : > { %v976_v28 = vld [vmem:[%s1949_s3 + $0x68] sm:$0xff] (!%p1237_p11) }
 0x170   : > { %958 = vst [vmem:[%s1949_s3 + $0x78] sm:$0xff] %v942_v0  ;;  %1022 = vst [vmem:[%s1949_s3 + $0x20] sm:$0xff] (!%p1237_p11), %v1006_v24  ;;  %v999_v41 = vadd.f32 (!%p1237_p11), %v1238_v2, %v976_v28  ;;  %v1014_v45 = vmax.f32 (!%p1237_p11), %v998_v38, 0.0 }
 0x172   : > { %v1015_v47 = vmax.f32 %v999_v41, 0.0  ;;  %1030 = vst [vmem:[%s1949_s3 + $0x60] sm:$0xff] %v1014_v45 }
 0x174   : > { %1031 = vst [vmem:[%s1949_s3 + $0x68] sm:$0xff] %v1015_v47 }
 0x175   : > { %v977_v33 = vld [vmem:[%s1949_s3 + $0x70] sm:$0xff] }
 0x176   : > { %v1000_v42 = vadd.f32 %v1238_v2, %v977_v33 }
 0x177   : > { %v978_v34 = vld [vmem:[%s1949_s3 + $0x78] sm:$0xff] }
 0x178   : > { %v1001_v46 = vadd.f32 %v1238_v2, %v978_v34  ;;  %v1016_v48 = vmax.f32 %v1000_v42, 0.0 }
 0x17a   : > { %v1017_v49 = vmax.f32 %v1001_v46, 0.0  ;;  %1032 = vst [vmem:[%s1949_s3 + $0x70] sm:$0xff] %v1016_v48 }
 0x17c   : > { %1033 = vst [vmem:[%s1949_s3 + $0x78] sm:$0xff] %v1017_v49 }
 0x17d PF: > { %s13_s16 = sadd.s32 1, %s1493_s16   ;;  %s1950_s12 = smov %s1481_s13 }
 0x17e   : > { %p10_p12 = scmp.ge.s32.totalorder %s13_s16, 8   ;;  %s1951_s13 = smov %s1551_s20 }
 0x17f   : > { %s1952_s14 = smov %s1489_s15  ;;  %s1953_s15 = smov %s1955_s17 }
 0x180   :  { %12 = sbr.rel (!%p10_p12) target bundleno = 3 (0x3), region = 113 }

// kernel: pspnet_forward.13
= control target key start
LH: loop header
LB: loop body
LE: loop exit
PB: predicated region body
PF: predicated region fallthrough
CT: control target
= control target key end

     0   :  { %v193_v0 = vmov 0.0   ;;  %vm194_vm0 = vmmov 0   ;;  %s248_s1 = inlined_call_operand.vmem [shape: bf16[128,128], index: 1, kind: input, shape index: {}]   ;;  %s249_s0 = inlined_call_operand.vmem [shape: bf16[8,128], index: 0, kind: input, shape index: {}]   ;;  %s250_s2 = inlined_call_operand.vmem [shape: f32[1,128], index: 2, kind: input, shape index: {}]   ;;  %s251_s3 = inlined_call_operand.vmem [shape: f32[8,128], index: 3, kind: output, shape index: {}]  }
   0x1   :  { %163 = vmatprep.subr.bf16.mxu0 %v193_v0  ;;  %v185_v1 = vld [vmem:[%s248_s1] sm:$0xff]   ;;  %179 = vmatprep.mubr.msk.bf16.mxu0 %vm194_vm0, %v193_v0  ;;  %v186_v2 = vld [vmem:[%s248_s1 + $0x8] sm:$0xff]   ;;  %v187_v3 = vld [vmem:[%s248_s1 + $0x10] sm:$0xff]  }
   0x2   :  { %164 = vmatpush3.bf16.msra.mxu0 %v185_v1  ;;  %v188_v4 = vld [vmem:[%s248_s1 + $0x18] sm:$0xff]   ;;  %v189_v5 = vld [vmem:[%s248_s1 + $0x20] sm:$0xff]   ;;  %v190_v6 = vld [vmem:[%s248_s1 + $0x28] sm:$0xff]  }
   0x3   :  { %165 = vmatprep.subr.bf16.mxu0 %v193_v0  ;;  %v191_v7 = vld [vmem:[%s248_s1 + $0x30] sm:$0xff]   ;;  %v192_v8 = vld [vmem:[%s248_s1 + $0x38] sm:$0xff]   ;;  %v21_v9 = vld [vmem:[%s249_s0] sm:$0xf] }
   0x4   :  { %v153_v11 = vld [vmem:[%s250_s2] ss:$0 sm:$0xff] }
   0x6   :  { %166 = vmatpush3.bf16.msra.mxu0 %v186_v2 }
   0x7   :  { %167 = vmatprep.subr.bf16.mxu0 %v193_v0 }
   0xa   :  { %168 = vmatpush3.bf16.msra.mxu0 %v187_v3 }
   0xb   :  { %169 = vmatprep.subr.bf16.mxu0 %v193_v0 }
   0xe   :  { %170 = vmatpush3.bf16.msra.mxu0 %v188_v4 }
   0xf   :  { %171 = vmatprep.subr.bf16.mxu0 %v193_v0 }
  0x12   :  { %172 = vmatpush3.bf16.msra.mxu0 %v189_v5 }
  0x13   :  { %173 = vmatprep.subr.bf16.mxu0 %v193_v0 }
  0x16   :  { %174 = vmatpush3.bf16.msra.mxu0 %v190_v6 }
  0x17   :  { %175 = vmatprep.subr.bf16.mxu0 %v193_v0 }
  0x1a   :  { %176 = vmatpush3.bf16.msra.mxu0 %v191_v7 }
  0x1b   :  { %177 = vmatprep.subr.bf16.mxu0 %v193_v0 }
  0x1e   :  { %178 = vmatpush3.bf16.msra.mxu0 %v192_v8 }
  0x21   :  { %180 = vmatmul.mubr.bf16.vlgmr.msra.gmra.mrb[0].mxu0 %v21_v9 }
  0xf4   :  { %v120_v10 = vpop.f32.mrb[0].mxu0 }
  0xf5   :  { %v181_v12 = vpop.f32.mrb[1].mxu0  ;;  %v139_v14 = vadd.f32 %v153_v11, %v120_v10 }
  0xf6   :  { %v123_v13 = vpop.f32.mrb[2].mxu0 }
  0xf7   :  { %v182_v15 = vpop.f32.mrb[3].mxu0  ;;  %140 = vst [vmem:[%s251_s3] sm:$0xff] %v139_v14 }

// kernel: pspnet_forward.14
= control target key start
LH: loop header
LB: loop body
LE: loop exit
PB: predicated region body
PF: predicated region fallthrough
CT: control target
= control target key end

     0   :  { %s838_s12 = smov 0   ;;  %s840_s13 = smov 0   ;;  %s939_s0 = inlined_call_operand.vmem [shape: bf16[16,128], index: 0, kind: input, shape index: {}]   ;;  %s940_s1 = inlined_call_operand.vmem [shape: bf16[128,1024], index: 1, kind: input, shape index: {}]   ;;  %s941_s2 = inlined_call_operand.vmem [shape: f32[1,1024], index: 2, kind: input, shape index: {}]   ;;  %s942_s3 = inlined_call_operand.vmem [shape: f32[16,1024], index: 3, kind: output, shape index: {}]  }
   0x1   :  { %s842_s14 = smov 0   ;;  %s844_s15 = smov 0  }
   0x2   :  { %s846_s16 = smov 0  }
   0x3 LB: > { %s28_s17 = sadd.s32 1, %s811_s15  ;;  %s674_s18 = sadd.s32 4294967295, %s815_s16   ;;  %s815_s16 = sphi %s846_s16, %s13_s16   ;;  %s811_s15 = sphi %s844_s15, %s947_s15   ;;  %s807_s14 = sphi %s842_s14, %s946_s14   ;;  %s803_s13 = sphi %s840_s13, %s945_s13   ;;  %s799_s12 = sphi %s838_s12, %s944_s12  }
   0x4   : > { %p30_p0 = scmp.ge.s32.totalorder %s28_s17, 4  ;;  %p76_p1 = scmp.ne.s32.totalorder %s803_s13, %s799_s12 }
   0x5   : > { %p77_p2 = scmp.eq.s32.totalorder %s815_s16, 0  ;;  %p134_p4 = scmp.eq.s32.totalorder %s674_s18, 3 }
   0x6   : > { %s949_s17 = smov (%p30_p0, %s28_s17), 0  ;;  %s69_s20 = sadd.s32 1, %s803_s13 }
   0x7   : > { %p78_p3 = por %p77_p2, %p76_p1  ;;  %s65_s19 = ssub.s32 %s811_s15, %s949_s17 }
   0x8   : > { %p67_p5 = scmp.eq.s32.totalorder %s65_s19, 0  ;;  %p873_p6 = por %p134_p4, %p76_p1 }
   0x9   : > { %p678_p7 = scmp.ge.s32.totalorder %s815_s16, 4 }
   0xa   : > { %s878_s22 = scalar_select %p67_p5, %s803_s13, %s69_s20  }
   0xb   : > { %168 = sbr.rel (%p678_p7) target bundleno = 38 (0x26), region = 20 }
  0x12   : > { %171 = sbr.rel (!%p78_p3) target bundleno = 38 (0x26), region = 24  ;;  %s173_s23 = sand.u32 (%p78_p3), 1, %s803_s13  }
  0x13   : > { %s708_s24 = sshll.u32 (%p78_p3), %s811_s15, 3  ;;  %s679_s25 = sshll.u32 (%p78_p3), %s173_s23, 7 }
  0x14   : > { %s886_s28 = scalar_lea.vmem (%p78_p3), %s940_s1, %s708_s24  ;;  %s175_s29 = scalar_lea.vmem (%p78_p3), [#allocation2], %s679_s25 }
  0x15   : > { %v239_v0 = vld [vmem:[%s886_s28] sm:$0xff] (%p78_p3) }
  0x16   : > { %v241_v1 = vld [vmem:[%s886_s28 + $0x20] sm:$0xff] (%p78_p3)  ;;  %240 = vst [vmem:[%s175_s29] sm:$0xff] (%p78_p3), %v239_v0 }
  0x17   : > { %v243_v2 = vld [vmem:[%s886_s28 + $0x40] sm:$0xff] (%p78_p3)  ;;  %242 = vst [vmem:[%s175_s29 + $0x8] sm:$0xff] (%p78_p3), %v241_v1 }
  0x18   : > { %244 = vst [vmem:[%s175_s29 + $0x10] sm:$0xff] (%p78_p3), %v243_v2  ;;  %v245_v3 = vld [vmem:[%s886_s28 + $0x60] sm:$0xff] (%p78_p3) }
  0x19   : > { %v247_v4 = vld [vmem:[%s886_s28 + $0x80] sm:$0xff]  ;;  %246 = vst [vmem:[%s175_s29 + $0x18] sm:$0xff] %v245_v3 }
  0x1a   : > { %v249_v5 = vld [vmem:[%s886_s28 + $0xa0] sm:$0xff]  ;;  %248 = vst [vmem:[%s175_s29 + $0x20] sm:$0xff] %v247_v4 }
  0x1b   : > { %250 = vst [vmem:[%s175_s29 + $0x28] sm:$0xff] %v249_v5  ;;  %v251_v6 = vld [vmem:[%s886_s28 + $0xc0] sm:$0xff] }
  0x1c   : > { %v253_v7 = vld [vmem:[%s886_s28 + $0xe0] sm:$0xff]  ;;  %252 = vst [vmem:[%s175_s29 + $0x30] sm:$0xff] %v251_v6 }
  0x1d   : > { %v255_v8 = vld [vmem:[%s886_s28 + $0x100] sm:$0xff]  ;;  %254 = vst [vmem:[%s175_s29 + $0x38] sm:$0xff] %v253_v7 }
  0x1e   : > { %256 = vst [vmem:[%s175_s29 + $0x40] sm:$0xff] %v255_v8  ;;  %v257_v9 = vld [vmem:[%s886_s28 + $0x120] sm:$0xff] }
  0x1f   : > { %v259_v10 = vld [vmem:[%s886_s28 + $0x140] sm:$0xff]  ;;  %258 = vst [vmem:[%s175_s29 + $0x48] sm:$0xff] %v257_v9 }
  0x20   : > { %v261_v11 = vld [vmem:[%s886_s28 + $0x160] sm:$0xff]  ;;  %260 = vst [vmem:[%s175_s29 + $0x50] sm:$0xff] %v259_v10 }
  0x21   : > { %262 = vst [vmem:[%s175_s29 + $0x58] sm:$0xff] %v261_v11  ;;  %v263_v12 = vld [vmem:[%s886_s28 + $0x180] sm:$0xff] }
  0x22   : > { %v265_v13 = vld [vmem:[%s886_s28 + $0x1a0] sm:$0xff]  ;;  %264 = vst [vmem:[%s175_s29 + $0x60] sm:$0xff] %v263_v12 }
  0x23   : > { %v267_v14 = vld [vmem:[%s886_s28 + $0x1c0] sm:$0xff]  ;;  %266 = vst [vmem:[%s175_s29 + $0x68] sm:$0xff] %v265_v13 }
  0x24   : > { %268 = vst [vmem:[%s175_s29 + $0x70] sm:$0xff] %v267_v14  ;;  %v269_v15 = vld [vmem:[%s886_s28 + $0x1e0] sm:$0xff] }
  0x25   : > { %270 = vst [vmem:[%s175_s29 + $0x78] sm:$0xff] %v269_v15 }
  0x26 PF: > { %p682_p8 = scmp.ge.s32.totalorder %s815_s16, 1  ;;  %p283_p9 = scmp.lt.s32.totalorder %s815_s16, 5 }
  0x28   : > { %p284_p10 = pnand %p682_p8, %p283_p9 }
  0x29   : > { %s290_s30 = sand.u32 (!%p284_p10), 1, %s799_s12   ;;  %v817_v16 = vmov (!%p284_p10), 0   ;;  %v776_v33 = vld [vmem:[%s939_s0] sm:$0xff] (!%p284_p10)   ;;  %s685_s8 = sshll.u32 (!%p284_p10), %s807_s14, 1  ;;  %v519_v34 = vlaneseq (!%p284_p10) }
  0x2a   : > { %287 = sbr.rel (%p284_p10) target bundleno = 303 (0x12f), region = 66  ;;  %s683_s4 = sshll.u32 (!%p284_p10), %s290_s30, 7  ;;  %491 = vmatprep.mubr.bf16.mxu0 (!%p284_p10), %v817_v16 }
  0x2b   : > { %s292_s5 = scalar_lea.vmem (!%p284_p10), [#allocation2], %s683_s4  ;;  %p336_p11 = scmp.lt.s32.totalorder (!%p284_p10), %s685_s8, 7  ;;  %v520_v35 = vshrl.u32 (!%p284_p10), %v519_v34, 7 }
  0x2c   : > { %v752_v17 = vld [vmem:[%s292_s5 + $0x4] ss:$8 sps:$4 sm:$0xff] (!%p284_p10)   ;;  %v754_v18 = vld [vmem:[%s292_s5] ss:$8 sps:$4 sm:$0xff] (!%p284_p10)   ;;  %v755_v19 = vld [vmem:[%s292_s5 + $0x14] ss:$8 sps:$4 sm:$0xff] (!%p284_p10)  }
  0x2d   : > { %459 = vmatprep.subr.bf16.mxu0 (!%p284_p10), %v752_v17  ;;  %v757_v20 = vld [vmem:[%s292_s5 + $0x10] ss:$8 sps:$4 sm:$0xff] (!%p284_p10)   ;;  %v758_v21 = vld [vmem:[%s292_s5 + $0x24] ss:$8 sps:$4 sm:$0xff] (!%p284_p10)   ;;  %v760_v22 = vld [vmem:[%s292_s5 + $0x20] ss:$8 sps:$4 sm:$0xff] (!%p284_p10)  }
  0x2e   : > { %460 = vmatpush1.bf16.msra.mxu0 (!%p284_p10), %v754_v18  ;;  %v761_v23 = vld [vmem:[%s292_s5 + $0x34] ss:$8 sps:$4 sm:$0xff] (!%p284_p10)   ;;  %v763_v24 = vld [vmem:[%s292_s5 + $0x30] ss:$8 sps:$4 sm:$0xff] (!%p284_p10)   ;;  %v764_v25 = vld [vmem:[%s292_s5 + $0x44] ss:$8 sps:$4 sm:$0xff] (!%p284_p10)  }
  0x2f   : > { %461 = vmatprep.subr.bf16.mxu0 (!%p284_p10), %v755_v19  ;;  %v766_v26 = vld [vmem:[%s292_s5 + $0x40] ss:$8 sps:$4 sm:$0xff] (!%p284_p10)   ;;  %v767_v27 = vld [vmem:[%s292_s5 + $0x54] ss:$8 sps:$4 sm:$0xff] (!%p284_p10)   ;;  %v769_v28 = vld [vmem:[%s292_s5 + $0x50] ss:$8 sps:$4 sm:$0xff] (!%p284_p10)  }
  0x30   : > { %v770_v29 = vld [vmem:[%s292_s5 + $0x64] ss:$8 sps:$4 sm:$0xff] (!%p284_p10)   ;;  %v772_v30 = vld [vmem:[%s292_s5 + $0x60] ss:$8 sps:$4 sm:$0xff] (!%p284_p10)   ;;  %v773_v31 = vld [vmem:[%s292_s5 + $0x74] ss:$8 sps:$4 sm:$0xff] (!%p284_p10)  }
  0x31   : > { %v775_v32 = vld [vmem:[%s292_s5 + $0x70] ss:$8 sps:$4 sm:$0xff]   ;;  %s951_s8 = smov (!%p336_p11, %s685_s8), 7  ;;  %v521_v36 = vsub.s32 0, %v520_v35  ;;  %v525_v38 = vsub.s32 1, %v520_v35  ;;  %s684_s18 = sshll.u32 %s290_s30, 5 }
  0x32   : > { %462 = vmatpush1.bf16.msra.mxu0 %v757_v20  ;;  %s338_s11 = scalar_lea.vmem %s941_s2, %s951_s8  ;;  %s323_s19 = scalar_lea.vmem [#allocation3], %s684_s18 }
  0x33   : > { %463 = vmatprep.subr.bf16.mxu0 %v758_v21  ;;  %v517_v37 = vld [vmem:[%s338_s11] sm:$0x3]  ;;  %s709_s12 = sshll.u32 (%p873_p6), %s807_s14, 4 }
  0x34   : > { %v522_v39 = vrot.slane %v517_v37, %v521_v36  ;;  %v526_v41 = vrot.slane %v517_v37, %v525_v38  ;;  %s549_s24 = scalar_lea.vmem (%p873_p6), %s942_s3, %s709_s12 }
  0x36   : > { %464 = vmatpush1.bf16.msra.mxu0 %v760_v22 }
  0x37   : > { %465 = vmatprep.subr.bf16.mxu0 %v761_v23 }
  0x3a   : > { %466 = vmatpush1.bf16.msra.mxu0 %v763_v24 }
  0x3b   : > { %467 = vmatprep.subr.bf16.mxu0 %v764_v25 }
  0x3e   : > { %468 = vmatpush1.bf16.msra.mxu0 %v766_v26 }
  0x3f   : > { %469 = vmatprep.subr.bf16.mxu0 %v767_v27 }
  0x42   : > { %470 = vmatpush1.bf16.msra.mxu0 %v769_v28 }
  0x43   : > { %471 = vmatprep.subr.bf16.mxu0 %v770_v29 }
  0x46   : > { %472 = vmatpush1.bf16.msra.mxu0 %v772_v30 }
  0x47   : > { %473 = vmatprep.subr.bf16.mxu0 %v773_v31 }
  0x4a   : > { %474 = vmatpush1.bf16.msra.mxu0 %v775_v32 }
  0x4d   : > { %492 = vmatmul.mubr.bf16.vlgmr.msra.gmra.mrb[0].mxu0 %v776_v33 }
 0x120   : > { %v493_v40 = vpop.f32.mrb[0].mxu0  ;;  %543 = sbr.rel (!%p873_p6) target bundleno = 303 (0x12f), region = 82 }
 0x121   : > { %v495_v42 = vpop.f32.mrb[1].mxu0  ;;  %v529_v44 = vadd.f32 %v522_v39, %v493_v40 }
 0x122   : > { %v497_v43 = vpop.f32.mrb[2].mxu0  ;;  %v530_v46 = vadd.f32 %v526_v41, %v495_v42 }
 0x123   : > { %v499_v45 = vpop.f32.mrb[3].mxu0  ;;  %533 = vst [vmem:[%s323_s19] sm:$0xff] %v529_v44  ;;  %v531_v47 = vadd.f32 %v522_v39, %v497_v43 }
 0x124   : > { %534 = vst [vmem:[%s323_s19 + $0x8] sm:$0xff] %v530_v46  ;;  %v532_v48 = vadd.f32 %v526_v41, %v499_v45 }
 0x125   : > { %535 = vst [vmem:[%s323_s19 + $0x10] sm:$0xff] %v531_v47 }
 0x126   : > { %536 = vst [vmem:[%s323_s19 + $0x18] sm:$0xff] %v532_v48 }
 0x12a   : > { %v562_v49 = vld [vmem:[%s323_s19] sm:$0xff] }
 0x12b   : > { %v564_v50 = vld [vmem:[%s323_s19 + $0x8] sm:$0xff]  ;;  %563 = vst [vmem:[%s549_s24] sm:$0xff] %v562_v49 }
 0x12c   : > { %v566_v51 = vld [vmem:[%s323_s19 + $0x10] sm:$0xff]  ;;  %565 = vst [vmem:[%s549_s24 + $0x8] sm:$0xff] %v564_v50 }
 0x12d   : > { %v568_v52 = vld [vmem:[%s323_s19 + $0x18] sm:$0xff]  ;;  %567 = vst [vmem:[%s549_s24 + $0x40] sm:$0xff] %v566_v51 }
 0x12e   : > { %569 = vst [vmem:[%s549_s24 + $0x48] sm:$0xff] %v568_v52 }
 0x12f PF: > { %s13_s16 = sadd.s32 1, %s815_s16   ;;  %s944_s12 = smov %s803_s13 }
 0x130   : > { %p10_p12 = scmp.ge.s32.totalorder %s13_s16, 6   ;;  %s945_s13 = smov %s878_s22 }
 0x131   : > { %s946_s14 = smov %s811_s15  ;;  %s947_s15 = smov %s949_s17 }
 0x132   :  { %12 = sbr.rel (!%p10_p12) target bundleno = 3 (0x3), region = 142 }

</bundles_post_ra>
